<compile_context>
chip_gen: v7x
topology: tpu7x:2x2x1
jax: 0.10.0
libtpu: 0.0.40
codegen_flags: <defaults>
</compile_context>

<pallas_src>
import functools

import jax
import jax.numpy as jnp
from jax import lax
from jax.experimental import pallas as pl
from jax.experimental.pallas import tpu as pltpu

KERNEL_SIZE = 7
PADDING = 3


def _decoder_kernel(x_ref, w_ref, b_ref, o_ref, *, ksize, pad, batch, chans):
    """Single-block conv1d + sigmoid (pure VPU/XLU path, no MXU).

    x_ref: (B*C, L)     batch-folded input tile (VMEM), lane axis = L
    w_ref: (O, B*C, K)  weight replicated over the batch fold, lane axis = K
    b_ref: (O,)         conv bias (SMEM scalars)
    o_ref: (O*B, L)     sigmoid(conv) output, lane-dense slab (o-major rows)
    """
    x = x_ref[...]                                   # (B*C, L)
    BC, L = x.shape
    O = w_ref.shape[0]
    B, C = batch, chans

    # Lane index, hoisted out of the tap loop (reused by every boundary mask).
    lane = lax.broadcasted_iota(jnp.int32, (1, L), 1)

    for o in range(O):
        acc = jnp.zeros((BC, L), dtype=jnp.float32)
        for k in range(ksize):
            d = k - pad
            # s[:, l] = x[:, l + d]; wrap-around lanes masked to emulate zero padding.
            s = x if d == 0 else pltpu.roll(x, (-d) % L, axis=1)   # XLU lane rotation
            if d > 0:
                s = jnp.where(lane < L - d, s, 0.0)
            elif d < 0:
                s = jnp.where(lane >= -d, s, 0.0)
            w_col = w_ref[o, :, k:k + 1]             # (B*C, 1), broadcast over lanes
            acc = acc + s * w_col                    # VPU FMA on the full (B*C, L) tile
        # Segmented channel reduction per batch element (sublane reduce), bias from SMEM.
        row = jnp.sum(acc.reshape(B, C, L), axis=1) + b_ref[o]     # (B, L)
        # Direct per-output-channel store (no concatenate / accumulator live-range growth).
        o_ref[o * B:(o + 1) * B, :] = jax.nn.sigmoid(row).astype(o_ref.dtype)


def decoder_forward(x, weight, bias):
    """x: [B, C, L] f32; weight: [O, C, K]; bias: [O].  Returns sigmoid(conv1d(x)) as [B, O, L]."""
    B, C, L = x.shape
    O, C_w, K = weight.shape
    assert C_w == C and K == KERNEL_SIZE

    # Fold batch into the sublane axis: one contiguous tile, one DMA in / one store out.
    x2d = x.reshape(B * C, L)
    # w_tiled[o, b*C + c, k] = weight[o, c, k]; lane axis = K so the whole weight is one
    # small contiguous slab instead of K strided (C,1) loads.
    w_tiled = jnp.tile(weight, (1, B, 1))            # (O, B*C, K)

    kernel = functools.partial(_decoder_kernel, ksize=K, pad=PADDING, batch=B, chans=C)

    itemsize = x.dtype.itemsize
    cost = pl.CostEstimate(
        flops=2 * B * O * C * K * L,
        transcendentals=2 * B * O * L,               # sigmoid ~ exp + reciprocal
        bytes_accessed=(x.size + w_tiled.size + bias.size + B * O * L) * itemsize,
    )

    out = pl.pallas_call(
        kernel,
        out_shape=jax.ShapeDtypeStruct((O * B, L), x.dtype),
        grid=(1,),
        in_specs=[
            pl.BlockSpec((B * C, L), lambda i: (0, 0)),             # activations (full block)
            pl.BlockSpec((O, B * C, K), lambda i: (0, 0, 0)),       # weights (full block)
            pl.BlockSpec(memory_space=pltpu.MemorySpace.SMEM),      # bias scalar(s)
        ],
        out_specs=pl.BlockSpec((O * B, L), lambda i: (0, 0)),
        compiler_params=pltpu.CompilerParams(
            dimension_semantics=("arbitrary",)),
        cost_estimate=cost,
    )(x2d, w_tiled, bias)

    # Kernel output is an o-major (O*B, L) lane-dense slab; restore [B, O, L] for the caller
    # (for O == 1 this is just a metadata reshape).
    return jnp.transpose(out.reshape(O, B, L), (1, 0, 2))


def _reference(x, weight, bias):
    """Pure-JAX reference (lax conv) mirroring nn.Conv1d + Sigmoid."""
    out = lax.conv_general_dilated(
        x, weight,
        window_strides=(1,),
        padding=[(PADDING, PADDING)],
        dimension_numbers=("NCH", "OIH", "NCH"),
    )
    return jax.nn.sigmoid(out + bias[None, :, None])


def _run_case(key, B, C, O, L):
    kx, kw, kb = jax.random.split(key, 3)
    x = jax.random.normal(kx, (B, C, L), dtype=jnp.float32)
    fan_in = C * KERNEL_SIZE
    bound = 1.0 / (fan_in ** 0.5)
    weight = jax.random.uniform(kw, (O, C, KERNEL_SIZE),
                                dtype=jnp.float32, minval=-bound, maxval=bound)
    bias = jax.random.uniform(kb, (O,), dtype=jnp.float32, minval=-bound, maxval=bound)

    out = jax.block_until_ready(decoder_forward(x, weight, bias))
    ref = jax.block_until_ready(_reference(x, weight, bias))

    assert out.shape == (B, O, L)
    assert jnp.allclose(out, ref, atol=1e-5, rtol=1e-5), "mismatch vs reference"


if __name__ == "__main__":
    key = jax.random.PRNGKey(0)
    k1, k2 = jax.random.split(key)

    # Module defaults: feature_num=64, out_channels=1.
    _run_case(k1, B=2, C=64, O=1, L=128)
    # Also exercise the multi-output-channel path (previously untested).
    _run_case(k2, B=2, C=32, O=3, L=128)

    print("KERNEL_OK")
</pallas_src>

<mosaic_0001>
module attributes {stable_mosaic.version = 11 : i64} {
  func.func @_decoder_kernel(%arg0: i32, %arg1: memref<128x128xf32, #tpu.memory_space<vmem>>, %arg2: memref<1x128x7xf32, #tpu.memory_space<vmem>>, %arg3: memref<1xf32, #tpu.memory_space<smem>>, %arg4: memref<2x128xf32, #tpu.memory_space<vmem>>) attributes {dimension_semantics = [#tpu.dimension_semantics<arbitrary>], iteration_bounds = array<i64: 1>, scalar_prefetch = 0 : i64, scratch_operands = 0 : i64, tpu.core_type = #tpu.core_type<tc>, window_params = [{pipeline_mode = #tpu.pipeline_mode<synchronous>, transform_indices = @transform_0, window_bounds = array<i64: 128, 128>}, {pipeline_mode = #tpu.pipeline_mode<synchronous>, transform_indices = @transform_1, window_bounds = array<i64: 1, 128, 7>}, {transform_indices = @transform_2, window_bounds = array<i64: 1>}, {pipeline_mode = #tpu.pipeline_mode<synchronous>, transform_indices = @transform_3, window_bounds = array<i64: 2, 128>}]} {
    %c0 = arith.constant 0 : index
    %c0_0 = arith.constant 0 : index
    %0 = vector.load %arg1[%c0, %c0_0] : memref<128x128xf32, #tpu.memory_space<vmem>>, vector<128x128xf32>
    %1 = tpu.iota {dimensions = array<i32: 1>} : vector<1x128xi32>
    %cst = arith.constant 0.000000e+00 : f32
    %2 = vector.broadcast %cst : f32 to vector<128x128xf32>
    %c3_i32 = arith.constant 3 : i32
    %3 = tpu.dynamic_rotate %0 by %c3_i32 dim 1 : vector<128x128xf32>, i32 -> vector<128x128xf32>
    %c3_i32_1 = arith.constant 3 : i32
    %4 = vector.broadcast %c3_i32_1 : i32 to vector<1x128xi32>
    %5 = arith.cmpi sge, %1, %4 : vector<1x128xi32>
    %cst_2 = arith.constant 0.000000e+00 : f32
    %6 = vector.shape_cast %5 : vector<1x128xi1> to vector<1x128xi1>
    %7 = vector.broadcast %6 : vector<1x128xi1> to vector<128x128xi1>
    %8 = vector.broadcast %cst_2 : f32 to vector<128x128xf32>
    %9 = arith.select %7, %3, %8 : vector<128x128xi1>, vector<128x128xf32>
    %c0_3 = arith.constant 0 : index
    %c0_4 = arith.constant 0 : index
    %c0_5 = arith.constant 0 : index
    %10 = vector.load %arg2[%c0_3, %c0_4, %c0_5] : memref<1x128x7xf32, #tpu.memory_space<vmem>>, vector<1x128x1xf32>
    %11 = vector.shape_cast %10 : vector<1x128x1xf32> to vector<128x1xf32>
    %12 = vector.broadcast %11 : vector<128x1xf32> to vector<128x128xf32>
    %13 = arith.mulf %9, %12 : vector<128x128xf32>
    %14 = arith.addf %2, %13 : vector<128x128xf32>
    %c2_i32 = arith.constant 2 : i32
    %15 = tpu.dynamic_rotate %0 by %c2_i32 dim 1 : vector<128x128xf32>, i32 -> vector<128x128xf32>
    %c2_i32_6 = arith.constant 2 : i32
    %16 = vector.broadcast %c2_i32_6 : i32 to vector<1x128xi32>
    %17 = arith.cmpi sge, %1, %16 : vector<1x128xi32>
    %cst_7 = arith.constant 0.000000e+00 : f32
    %18 = vector.shape_cast %17 : vector<1x128xi1> to vector<1x128xi1>
    %19 = vector.broadcast %18 : vector<1x128xi1> to vector<128x128xi1>
    %20 = vector.broadcast %cst_7 : f32 to vector<128x128xf32>
    %21 = arith.select %19, %15, %20 : vector<128x128xi1>, vector<128x128xf32>
    %c0_8 = arith.constant 0 : index
    %c0_9 = arith.constant 0 : index
    %c1 = arith.constant 1 : index
    %22 = vector.load %arg2[%c0_8, %c0_9, %c1] : memref<1x128x7xf32, #tpu.memory_space<vmem>>, vector<1x128x1xf32>
    %23 = vector.shape_cast %22 : vector<1x128x1xf32> to vector<128x1xf32>
    %24 = vector.broadcast %23 : vector<128x1xf32> to vector<128x128xf32>
    %25 = arith.mulf %21, %24 : vector<128x128xf32>
    %26 = arith.addf %14, %25 : vector<128x128xf32>
    %c1_i32 = arith.constant 1 : i32
    %27 = tpu.dynamic_rotate %0 by %c1_i32 dim 1 : vector<128x128xf32>, i32 -> vector<128x128xf32>
    %c1_i32_10 = arith.constant 1 : i32
    %28 = vector.broadcast %c1_i32_10 : i32 to vector<1x128xi32>
    %29 = arith.cmpi sge, %1, %28 : vector<1x128xi32>
    %cst_11 = arith.constant 0.000000e+00 : f32
    %30 = vector.shape_cast %29 : vector<1x128xi1> to vector<1x128xi1>
    %31 = vector.broadcast %30 : vector<1x128xi1> to vector<128x128xi1>
    %32 = vector.broadcast %cst_11 : f32 to vector<128x128xf32>
    %33 = arith.select %31, %27, %32 : vector<128x128xi1>, vector<128x128xf32>
    %c0_12 = arith.constant 0 : index
    %c0_13 = arith.constant 0 : index
    %c2 = arith.constant 2 : index
    %34 = vector.load %arg2[%c0_12, %c0_13, %c2] : memref<1x128x7xf32, #tpu.memory_space<vmem>>, vector<1x128x1xf32>
    %35 = vector.shape_cast %34 : vector<1x128x1xf32> to vector<128x1xf32>
    %36 = vector.broadcast %35 : vector<128x1xf32> to vector<128x128xf32>
    %37 = arith.mulf %33, %36 : vector<128x128xf32>
    %38 = arith.addf %26, %37 : vector<128x128xf32>
    %c0_14 = arith.constant 0 : index
    %c0_15 = arith.constant 0 : index
    %c3 = arith.constant 3 : index
    %39 = vector.load %arg2[%c0_14, %c0_15, %c3] : memref<1x128x7xf32, #tpu.memory_space<vmem>>, vector<1x128x1xf32>
    %40 = vector.shape_cast %39 : vector<1x128x1xf32> to vector<128x1xf32>
    %41 = vector.broadcast %40 : vector<128x1xf32> to vector<128x128xf32>
    %42 = arith.mulf %0, %41 : vector<128x128xf32>
    %43 = arith.addf %38, %42 : vector<128x128xf32>
    %c127_i32 = arith.constant 127 : i32
    %44 = tpu.dynamic_rotate %0 by %c127_i32 dim 1 : vector<128x128xf32>, i32 -> vector<128x128xf32>
    %c127_i32_16 = arith.constant 127 : i32
    %45 = vector.broadcast %c127_i32_16 : i32 to vector<1x128xi32>
    %46 = arith.cmpi slt, %1, %45 : vector<1x128xi32>
    %cst_17 = arith.constant 0.000000e+00 : f32
    %47 = vector.shape_cast %46 : vector<1x128xi1> to vector<1x128xi1>
    %48 = vector.broadcast %47 : vector<1x128xi1> to vector<128x128xi1>
    %49 = vector.broadcast %cst_17 : f32 to vector<128x128xf32>
    %50 = arith.select %48, %44, %49 : vector<128x128xi1>, vector<128x128xf32>
    %c0_18 = arith.constant 0 : index
    %c0_19 = arith.constant 0 : index
    %c4 = arith.constant 4 : index
    %51 = vector.load %arg2[%c0_18, %c0_19, %c4] : memref<1x128x7xf32, #tpu.memory_space<vmem>>, vector<1x128x1xf32>
    %52 = vector.shape_cast %51 : vector<1x128x1xf32> to vector<128x1xf32>
    %53 = vector.broadcast %52 : vector<128x1xf32> to vector<128x128xf32>
    %54 = arith.mulf %50, %53 : vector<128x128xf32>
    %55 = arith.addf %43, %54 : vector<128x128xf32>
    %c126_i32 = arith.constant 126 : i32
    %56 = tpu.dynamic_rotate %0 by %c126_i32 dim 1 : vector<128x128xf32>, i32 -> vector<128x128xf32>
    %c126_i32_20 = arith.constant 126 : i32
    %57 = vector.broadcast %c126_i32_20 : i32 to vector<1x128xi32>
    %58 = arith.cmpi slt, %1, %57 : vector<1x128xi32>
    %cst_21 = arith.constant 0.000000e+00 : f32
    %59 = vector.shape_cast %58 : vector<1x128xi1> to vector<1x128xi1>
    %60 = vector.broadcast %59 : vector<1x128xi1> to vector<128x128xi1>
    %61 = vector.broadcast %cst_21 : f32 to vector<128x128xf32>
    %62 = arith.select %60, %56, %61 : vector<128x128xi1>, vector<128x128xf32>
    %c0_22 = arith.constant 0 : index
    %c0_23 = arith.constant 0 : index
    %c5 = arith.constant 5 : index
    %63 = vector.load %arg2[%c0_22, %c0_23, %c5] : memref<1x128x7xf32, #tpu.memory_space<vmem>>, vector<1x128x1xf32>
    %64 = vector.shape_cast %63 : vector<1x128x1xf32> to vector<128x1xf32>
    %65 = vector.broadcast %64 : vector<128x1xf32> to vector<128x128xf32>
    %66 = arith.mulf %62, %65 : vector<128x128xf32>
    %67 = arith.addf %55, %66 : vector<128x128xf32>
    %c125_i32 = arith.constant 125 : i32
    %68 = tpu.dynamic_rotate %0 by %c125_i32 dim 1 : vector<128x128xf32>, i32 -> vector<128x128xf32>
    %c125_i32_24 = arith.constant 125 : i32
    %69 = vector.broadcast %c125_i32_24 : i32 to vector<1x128xi32>
    %70 = arith.cmpi slt, %1, %69 : vector<1x128xi32>
    %cst_25 = arith.constant 0.000000e+00 : f32
    %71 = vector.shape_cast %70 : vector<1x128xi1> to vector<1x128xi1>
    %72 = vector.broadcast %71 : vector<1x128xi1> to vector<128x128xi1>
    %73 = vector.broadcast %cst_25 : f32 to vector<128x128xf32>
    %74 = arith.select %72, %68, %73 : vector<128x128xi1>, vector<128x128xf32>
    %c0_26 = arith.constant 0 : index
    %c0_27 = arith.constant 0 : index
    %c6 = arith.constant 6 : index
    %75 = vector.load %arg2[%c0_26, %c0_27, %c6] : memref<1x128x7xf32, #tpu.memory_space<vmem>>, vector<1x128x1xf32>
    %76 = vector.shape_cast %75 : vector<1x128x1xf32> to vector<128x1xf32>
    %77 = vector.broadcast %76 : vector<128x1xf32> to vector<128x128xf32>
    %78 = arith.mulf %74, %77 : vector<128x128xf32>
    %79 = arith.addf %67, %78 : vector<128x128xf32>
    %80 = vector.shape_cast %79 : vector<128x128xf32> to vector<2x64x128xf32>
    %cst_28 = arith.constant dense<0.000000e+00> : vector<2x128xf32>
    %81 = vector.multi_reduction <add>, %80, %cst_28 [1] : vector<2x64x128xf32> to vector<2x128xf32>
    %c0_29 = arith.constant 0 : index
    %82 = memref.load %arg3[%c0_29] : memref<1xf32, #tpu.memory_space<smem>>
    %83 = vector.broadcast %82 : f32 to vector<2x128xf32>
    %84 = arith.addf %81, %83 : vector<2x128xf32>
    %85 = arith.negf %84 : vector<2x128xf32>
    %86 = math.exp %85 : vector<2x128xf32>
    %cst_30 = arith.constant 1.000000e+00 : f32
    %87 = vector.broadcast %cst_30 : f32 to vector<2x128xf32>
    %88 = arith.addf %87, %86 : vector<2x128xf32>
    %89 = arith.divf %87, %88 : vector<2x128xf32>
    %c0_31 = arith.constant 0 : index
    %c0_32 = arith.constant 0 : index
    %90 = vector.load %arg4[%c0_31, %c0_32] : memref<2x128xf32, #tpu.memory_space<vmem>>, vector<2x128xf32>
    tpu.vector_store %arg4[%c0_31, %c0_32], %89 {strides = array<i32>} : memref<2x128xf32, #tpu.memory_space<vmem>>, vector<2x128xf32>,
    return
  }
  func.func @transform_0(%arg0: i32) -> (i32, i32) {
    %c0_i32 = arith.constant 0 : i32
    %c0_i32_0 = arith.constant 0 : i32
    %c0_i32_1 = arith.constant 0 : i32
    return %c0_i32, %c0_i32_0 : i32, i32
  }
  func.func @transform_1(%arg0: i32) -> (i32, i32, i32) {
    %c0_i32 = arith.constant 0 : i32
    %c0_i32_0 = arith.constant 0 : i32
    %c0_i32_1 = arith.constant 0 : i32
    %c0_i32_2 = arith.constant 0 : i32
    return %c0_i32, %c0_i32_0, %c0_i32_1 : i32, i32, i32
  }
  func.func @transform_2(%arg0: i32) -> i32 {
    %c0_i32 = arith.constant 0 : i32
    %c0_i32_0 = arith.constant 0 : i32
    return %c0_i32 : i32
  }
  func.func @transform_3(%arg0: i32) -> (i32, i32) {
    %c0_i32 = arith.constant 0 : i32
    %c0_i32_0 = arith.constant 0 : i32
    %c0_i32_1 = arith.constant 0 : i32
    return %c0_i32, %c0_i32_0 : i32, i32
  }
}

</mosaic_0001>

<bundles_post_ra>
// kernel: tpu_custom_call.1
= control target key start
LH: loop header
LB: loop body
LE: loop exit
PB: predicated region body
PF: predicated region fallthrough
CT: control target
= control target key end

     0   :  { %s1183_s16 = smov 3   ;;  %v1184_v4 = vmov 0   ;;  %s2430_s0 = inlined_call_operand.vmem [shape: f32[128,128], index: 0, kind: input, shape index: {}]   ;;  %s2431_s1 = inlined_call_operand.vmem [shape: f32[1,128,7], index: 1, kind: input, shape index: {}]   ;;  %s2432_s2 = inlined_call_operand.<no memory space> [shape: f32[1], index: 2, kind: input, shape index: {}]   ;;  %s2433_s3 = inlined_call_operand.hbm [shape: f32[2,128], index: 3, kind: output, shape index: {}]  }
   0x1   :  { %v1220_v0 = vld [vmem:[%s2430_s0 + $0x10] sm:$0xff]  ;;  %v1225_v1 = vld [vmem:[%s2430_s0] sm:$0xff]  ;;  %v1234_v2 = vld [vmem:[%s2430_s0 + $0x18] sm:$0xff]  ;;  %1123 = vset.pattern.permute.xlu1 %v1184_v4  ;;  %1122 = vset.pattern.permute.xlu0 %v1184_v4 }
   0x2   :  { %38 = vrot.lane.b32.xlu1 %v1220_v0, %s1183_s16  ;;  %34 = vrot.lane.b32.xlu0 %v1225_v1, %s1183_s16  ;;  %v1239_v3 = vld [vmem:[%s2430_s0 + $0x8] sm:$0xff]  ;;  %v1253_v6 = vld [vmem:[%s2430_s0 + $0x20] sm:$0xff] }
   0x3   :  { %2442 = vst [vmem:[#allocation6_spill] sm:$0xff] %v1239_v3  ;;  %v1248_v5 = vld [vmem:[%s2430_s0 + $0x28] sm:$0xff]  ;;  %v1262_v7 = vld [vmem:[%s2430_s0 + $0x38] sm:$0xff]  ;;  %v1267_v8 = vld [vmem:[%s2430_s0 + $0x30] sm:$0xff] }
   0x4   :  { %2443 = vst [vmem:[#allocation7_spill] sm:$0xff] %v1248_v5  ;;  %2444 = vst [vmem:[#allocation8_spill] sm:$0xff] %v1262_v7 }
   0x5   :  { %2445 = vst [vmem:[#allocation9_spill] sm:$0xff] %v1267_v8 }
   0x6   :  { %40 = vrot.lane.b32.xlu1 %v1234_v2, %s1183_s16  ;;  %36 = vrot.lane.b32.xlu0 %v1239_v3, %s1183_s16 }
   0xa   :  { %44 = vrot.lane.b32.xlu1 %v1248_v5, %s1183_s16  ;;  %42 = vrot.lane.b32.xlu0 %v1253_v6, %s1183_s16 }
   0xb   :  { %9 = vsyncpa [#allocation4], 0  ;;  %v1276_v9 = vld [vmem:[%s2430_s0 + $0x48] sm:$0xff]  ;;  %v1281_v10 = vld [vmem:[%s2430_s0 + $0x40] sm:$0xff]  ;;  %s1185_s24 = smov 2   ;;  %v1186_v33 = vmov 1  }
   0xc   :  { %v1290_v11 = vld [vmem:[%s2430_s0 + $0x58] sm:$0xff]  ;;  %v1295_v12 = vld [vmem:[%s2430_s0 + $0x50] sm:$0xff]  ;;  %v1304_v13 = vld [vmem:[%s2430_s0 + $0x68] sm:$0xff]  ;;  %v1188_v40 = vmov 2   ;;  %s1192_s25 = smov 126   ;;  %s1194_s26 = smov 125  }
   0xd   :  { %v1309_v14 = vld [vmem:[%s2430_s0 + $0x60] sm:$0xff]  ;;  %v1318_v15 = vld [vmem:[%s2430_s0 + $0x78] sm:$0xff]  ;;  %v1323_v16 = vld [vmem:[%s2430_s0 + $0x70] sm:$0xff]  ;;  %vm1088_vm6 = vcmask 1041409  }
   0xe   :  { %48 = vrot.lane.b32.xlu1 %v1262_v7, %s1183_s16  ;;  %46 = vrot.lane.b32.xlu0 %v1267_v8, %s1183_s16  ;;  %v1332_v17 = vld [vmem:[%s2431_s1 + $0x8] sm:$0xff]  ;;  %v1337_v18 = vld [vmem:[%s2431_s1] sm:$0xff] }
   0xf   :  { %v1344_v19 = vld [vmem:[%s2431_s1 + $0x10] sm:$0xff]  ;;  %v1349_v20 = vld [vmem:[%s2431_s1 + $0x18] sm:$0xff]  ;;  %v1356_v21 = vld [vmem:[%s2431_s1 + $0x20] sm:$0xff] }
  0x10   :  { %v1361_v22 = vld [vmem:[%s2431_s1 + $0x28] sm:$0xff]  ;;  %v1368_v23 = vld [vmem:[%s2431_s1 + $0x30] sm:$0xff]  ;;  %v1373_v24 = vld [vmem:[%s2431_s1 + $0x38] sm:$0xff] }
  0x11   :  { %v1380_v25 = vld [vmem:[%s2431_s1 + $0x40] sm:$0xff]  ;;  %v1385_v26 = vld [vmem:[%s2431_s1 + $0x48] sm:$0xff]  ;;  %v1392_v27 = vld [vmem:[%s2431_s1 + $0x50] sm:$0xff] }
  0x12   :  { %52 = vrot.lane.b32.xlu1 %v1276_v9, %s1183_s16  ;;  %50 = vrot.lane.b32.xlu0 %v1281_v10, %s1183_s16  ;;  %v1397_v28 = vld [vmem:[%s2431_s1 + $0x58] sm:$0xff]  ;;  %v1404_v29 = vld [vmem:[%s2431_s1 + $0x60] sm:$0xff] }
  0x13   :  { %v1409_v30 = vld [vmem:[%s2431_s1 + $0x68] sm:$0xff]  ;;  %v1416_v31 = vld [vmem:[%s2431_s1 + $0x70] sm:$0xff]  ;;  %v1421_v32 = vld [vmem:[%s2431_s1 + $0x78] sm:$0xff]  ;;  %s1187_s1 = smov 1  }
  0x16   :  { %56 = vrot.lane.b32.xlu1 %v1290_v11, %s1183_s16  ;;  %54 = vrot.lane.b32.xlu0 %v1295_v12, %s1183_s16 }
  0x1a   :  { %60 = vrot.lane.b32.xlu1 %v1304_v13, %s1183_s16  ;;  %58 = vrot.lane.b32.xlu0 %v1309_v14, %s1183_s16 }
  0x1e   :  { %64 = vrot.lane.b32.xlu1 %v1318_v15, %s1183_s16  ;;  %62 = vrot.lane.b32.xlu0 %v1323_v16, %s1183_s16  ;;  %s1190_s16 = smov 127  }
  0x22   :  { %108 = vperm.xlu1 %1123, %v1332_v17   ;;  %103 = vperm.xlu0 %1122, %v1337_v18  }
  0x26   :  { %113 = vperm.xlu1 %1123, %v1344_v19   ;;  %118 = vperm.xlu0 %1122, %v1349_v20  }
  0x2a   :  { %123 = vperm.xlu1 %1123, %v1356_v21   ;;  %128 = vperm.xlu0 %1122, %v1361_v22  }
  0x2e   :  { %133 = vperm.xlu1 %1123, %v1368_v23   ;;  %138 = vperm.xlu0 %1122, %v1373_v24  }
  0x32   :  { %143 = vperm.xlu1 %1123, %v1380_v25   ;;  %148 = vperm.xlu0 %1122, %v1385_v26  }
  0x36   :  { %153 = vperm.xlu1 %1123, %v1392_v27   ;;  %158 = vperm.xlu0 %1122, %v1397_v28  }
  0x3a   :  { %163 = vperm.xlu1 %1123, %v1404_v29   ;;  %168 = vperm.xlu0 %1122, %v1409_v30  }
  0x3e   :  { %173 = vperm.xlu1 %1123, %v1416_v31   ;;  %178 = vperm.xlu0 %1122, %v1421_v32  }
  0x42   :  { %213 = vrot.lane.b32.xlu1 %v1225_v1, %s1185_s24  ;;  %215 = vrot.lane.b32.xlu0 %v1239_v3, %s1185_s24 }
  0x43   :  { %1124 = vset.pattern.permute.xlu1 %v1186_v33  ;;  %1125 = vset.pattern.permute.xlu0 %v1186_v33 }
  0x46   :  { %217 = vrot.lane.b32.xlu1 %v1220_v0, %s1185_s24  ;;  %219 = vrot.lane.b32.xlu0 %v1234_v2, %s1185_s24 }
  0x4a   :  { %221 = vrot.lane.b32.xlu1 %v1253_v6, %s1185_s24  ;;  %223 = vrot.lane.b32.xlu0 %v1248_v5, %s1185_s24 }
  0x4e   :  { %225 = vrot.lane.b32.xlu1 %v1267_v8, %s1185_s24  ;;  %227 = vrot.lane.b32.xlu0 %v1262_v7, %s1185_s24 }
  0x52   :  { %229 = vrot.lane.b32.xlu1 %v1281_v10, %s1185_s24  ;;  %231 = vrot.lane.b32.xlu0 %v1276_v9, %s1185_s24 }
  0x56   :  { %233 = vrot.lane.b32.xlu1 %v1295_v12, %s1185_s24  ;;  %235 = vrot.lane.b32.xlu0 %v1290_v11, %s1185_s24 }
  0x5a   :  { %237 = vrot.lane.b32.xlu1 %v1309_v14, %s1185_s24  ;;  %239 = vrot.lane.b32.xlu0 %v1304_v13, %s1185_s24 }
  0x5e   :  { %241 = vrot.lane.b32.xlu1 %v1323_v16, %s1185_s24  ;;  %243 = vrot.lane.b32.xlu0 %v1318_v15, %s1185_s24  ;;  %s1196_s24 = smov [#allocation3]  }
  0x62   :  { %265 = vperm.xlu1 %1124, %v1337_v18   ;;  %269 = vperm.xlu0 %1125, %v1332_v17  }
  0x66   :  { %273 = vperm.xlu1 %1124, %v1344_v19   ;;  %281 = vperm.xlu0 %1125, %v1356_v21  }
  0x6a   :  { %277 = vperm.xlu1 %1124, %v1349_v20   ;;  %289 = vperm.xlu0 %1125, %v1368_v23  }
  0x6e   :  { %285 = vperm.xlu1 %1124, %v1361_v22   ;;  %297 = vperm.xlu0 %1125, %v1380_v25  }
  0x72   :  { %293 = vperm.xlu1 %1124, %v1373_v24   ;;  %305 = vperm.xlu0 %1125, %v1392_v27  }
  0x74   :  { %v1451_v34 = vpop.permute.xlu1 %38  ;;  %v1453_v35 = vpop.permute.xlu0 %34 }
  0x75   :  { %2446 = vst [vmem:[#allocation10_spill] sm:$0xff] %v1451_v34  ;;  %2447 = vst [vmem:[#allocation11_spill] sm:$0xff] %v1453_v35 }
  0x76   :  { %301 = vperm.xlu1 %1124, %v1385_v26   ;;  %313 = vperm.xlu0 %1125, %v1404_v29  }
  0x78   :  { %v1457_v36 = vpop.permute.xlu0 %36  ;;  %v1459_v37 = vpop.permute.xlu1 %40 }
  0x79   :  { %2448 = vst [vmem:[#allocation12_spill] sm:$0xff] %v1457_v36  ;;  %2449 = vst [vmem:[#allocation13_spill] sm:$0xff] %v1459_v37 }
  0x7a   :  { %309 = vperm.xlu1 %1124, %v1397_v28   ;;  %321 = vperm.xlu0 %1125, %v1416_v31  }
  0x7c   :  { %v1463_v38 = vpop.permute.xlu0 %42  ;;  %v1468_v39 = vpop.permute.xlu1 %44 }
  0x7d   :  { %2450 = vst [vmem:[#allocation14_spill] sm:$0xff] %v1463_v38  ;;  %2451 = vst [vmem:[#allocation15_spill] sm:$0xff] %v1468_v39 }
  0x7e   :  { %317 = vperm.xlu1 %1124, %v1409_v30   ;;  %360 = vrot.lane.b32.xlu0 %v1225_v1, %s1187_s1 }
  0x7f   :  { %1126 = vset.pattern.permute.xlu0 %v1188_v40 }
  0x80   :  { %v1473_v41 = vpop.permute.xlu0 %46  ;;  %v1475_v42 = vpop.permute.xlu1 %48 }
  0x81   :  { %2452 = vst [vmem:[#allocation16_spill] sm:$0xff] %v1473_v41  ;;  %2453 = vst [vmem:[#allocation17_spill] sm:$0xff] %v1475_v42 }
  0x82   :  { %325 = vperm.xlu1 %1124, %v1421_v32   ;;  %364 = vrot.lane.b32.xlu0 %v1220_v0, %s1187_s1 }
  0x84   :  { %v1481_v43 = vpop.permute.xlu0 %50  ;;  %v1487_v44 = vpop.permute.xlu1 %52 }
  0x85   :  { %2454 = vst [vmem:[#allocation18_spill] sm:$0xff] %v1487_v44 }
  0x86   :  { %362 = vrot.lane.b32.xlu1 %v1239_v3, %s1187_s1  ;;  %368 = vrot.lane.b32.xlu0 %v1253_v6, %s1187_s1 }
  0x87   :  { %1127 = vset.pattern.permute.xlu1 %v1188_v40 }
  0x88   :  { %v1493_v45 = vpop.permute.xlu0 %54  ;;  %v1495_v46 = vpop.permute.xlu1 %56 }
  0x89   :  { %2455 = vst [vmem:[#allocation19_spill] sm:$0xff] %v1495_v46 }
  0x8a   :  { %366 = vrot.lane.b32.xlu1 %v1234_v2, %s1187_s1  ;;  %372 = vrot.lane.b32.xlu0 %v1267_v8, %s1187_s1 }
  0x8c   :  { %v1501_v47 = vpop.permute.xlu0 %58  ;;  %v1507_v48 = vpop.permute.xlu1 %60 }
  0x8d   :  { %2456 = vst [vmem:[#allocation20_spill] sm:$0xff] %v1507_v48  ;;  %v1189_v48 = vmov 3  }
  0x8e   :  { %370 = vrot.lane.b32.xlu1 %v1248_v5, %s1187_s1  ;;  %376 = vrot.lane.b32.xlu0 %v1281_v10, %s1187_s1 }
  0x90   :  { %v1513_v49 = vpop.permute.xlu0 %62  ;;  %v1515_v50 = vpop.permute.xlu1 %64 }
  0x91   :  { %2457 = vst [vmem:[#allocation21_spill] sm:$0xff] %v1515_v50 }
  0x92   :  { %374 = vrot.lane.b32.xlu1 %v1262_v7, %s1187_s1  ;;  %380 = vrot.lane.b32.xlu0 %v1295_v12, %s1187_s1 }
  0x96   :  { %378 = vrot.lane.b32.xlu1 %v1276_v9, %s1187_s1  ;;  %384 = vrot.lane.b32.xlu0 %v1309_v14, %s1187_s1 }
  0x9a   :  { %382 = vrot.lane.b32.xlu1 %v1290_v11, %s1187_s1  ;;  %388 = vrot.lane.b32.xlu0 %v1323_v16, %s1187_s1 }
  0x9e   :  { %386 = vrot.lane.b32.xlu1 %v1304_v13, %s1187_s1  ;;  %412 = vperm.xlu0 %1126, %v1337_v18  }
  0xa1   :  { %v1520_v51 = vpop.permute.xlu1 %108  ;;  %v1522_v52 = vpop.permute.xlu0 %103 }
  0xa2   :  { %2458 = vst [vmem:[#allocation22_spill] sm:$0xff] %v1520_v51  ;;  %2459 = vst [vmem:[#allocation23_spill] sm:$0xff] %v1522_v52  ;;  %390 = vrot.lane.b32.xlu1 %v1318_v15, %s1187_s1  ;;  %424 = vperm.xlu0 %1126, %v1349_v20  }
  0xa5   :  { %v1527_v53 = vpop.permute.xlu1 %113  ;;  %v1529_v54 = vpop.permute.xlu0 %118 }
  0xa6   :  { %2460 = vst [vmem:[#allocation24_spill] sm:$0xff] %v1527_v53  ;;  %2461 = vst [vmem:[#allocation25_spill] sm:$0xff] %v1529_v54  ;;  %416 = vperm.xlu1 %1127, %v1332_v17   ;;  %432 = vperm.xlu0 %1126, %v1361_v22  }
  0xa9   :  { %v1533_v55 = vpop.permute.xlu1 %123  ;;  %v1535_v56 = vpop.permute.xlu0 %128 }
  0xaa   :  { %2462 = vst [vmem:[#allocation26_spill] sm:$0xff] %v1533_v55  ;;  %2463 = vst [vmem:[#allocation27_spill] sm:$0xff] %v1535_v56  ;;  %420 = vperm.xlu1 %1127, %v1344_v19   ;;  %440 = vperm.xlu0 %1126, %v1373_v24  }
  0xad   :  { %v1539_v57 = vpop.permute.xlu1 %133  ;;  %v1541_v58 = vpop.permute.xlu0 %138 }
  0xae   :  { %2464 = vst [vmem:[#allocation28_spill] sm:$0xff] %v1539_v57  ;;  %2465 = vst [vmem:[#allocation29_spill] sm:$0xff] %v1541_v58  ;;  %428 = vperm.xlu1 %1127, %v1356_v21   ;;  %448 = vperm.xlu0 %1126, %v1385_v26  }
  0xb1   :  { %v1545_v59 = vpop.permute.xlu1 %143  ;;  %v1547_v60 = vpop.permute.xlu0 %148 }
  0xb2   :  { %2466 = vst [vmem:[#allocation30_spill] sm:$0xff] %v1547_v60  ;;  %436 = vperm.xlu1 %1127, %v1368_v23   ;;  %456 = vperm.xlu0 %1126, %v1397_v28  }
  0xb5   :  { %v1551_v61 = vpop.permute.xlu1 %153  ;;  %v1553_v62 = vpop.permute.xlu0 %158 }
  0xb6   :  { %2467 = vst [vmem:[#allocation31_spill] sm:$0xff] %v1553_v62  ;;  %444 = vperm.xlu1 %1127, %v1380_v25   ;;  %464 = vperm.xlu0 %1126, %v1409_v30  }
  0xb9   :  { %v1557_v63 = vpop.permute.xlu1 %163  ;;  %v1559_v4 = vpop.permute.xlu0 %168 }
  0xba   :  { %2468 = vst [vmem:[#allocation32_spill] sm:$0xff] %v1559_v4  ;;  %452 = vperm.xlu1 %1127, %v1392_v27   ;;  %472 = vperm.xlu0 %1126, %v1421_v32  }
  0xbd   :  { %v1563_v33 = vpop.permute.xlu1 %173  ;;  %v1565_v40 = vpop.permute.xlu0 %178 }
  0xbe   :  { %2469 = vst [vmem:[#allocation33_spill] sm:$0xff] %v1565_v40  ;;  %460 = vperm.xlu1 %1127, %v1404_v29   ;;  %1129 = vset.pattern.permute.xlu0 %v1189_v48 }
  0xbf   :  { %512 = vperm.xlu0 %1129, %v1332_v17  }
  0xc1   :  { %v1569_v50 = vpop.permute.xlu1 %213  ;;  %v1571_v60 = vpop.permute.xlu0 %215 }
  0xc2   :  { %2470 = vst [vmem:[#allocation34_spill] sm:$0xff] %v1569_v50  ;;  %2471 = vst [vmem:[#allocation35_spill] sm:$0xff] %v1571_v60  ;;  %468 = vperm.xlu1 %1127, %v1416_v31  }
  0xc3   :  { %524 = vperm.xlu0 %1129, %v1356_v21  }
  0xc5   :  { %v1575_v4 = vpop.permute.xlu1 %217  ;;  %v1577_v44 = vpop.permute.xlu0 %219 }
  0xc6   :  { %2472 = vst [vmem:[#allocation36_spill] sm:$0xff] %v1575_v4  ;;  %2473 = vst [vmem:[#allocation37_spill] sm:$0xff] %v1577_v44  ;;  %1128 = vset.pattern.permute.xlu1 %v1189_v48 }
  0xc7   :  { %508 = vperm.xlu1 %1128, %v1337_v18   ;;  %532 = vperm.xlu0 %1129, %v1368_v23  }
  0xc9   :  { %v1581_v40 = vpop.permute.xlu1 %221  ;;  %v1583_v58 = vpop.permute.xlu0 %223 }
  0xca   :  { %2474 = vst [vmem:[#allocation38_spill] sm:$0xff] %v1581_v40  ;;  %2475 = vst [vmem:[#allocation39_spill] sm:$0xff] %v1583_v58 }
  0xcb   :  { %516 = vperm.xlu1 %1128, %v1344_v19   ;;  %540 = vperm.xlu0 %1129, %v1380_v25  }
  0xcd   :  { %v1587_v62 = vpop.permute.xlu1 %225  ;;  %v1589_v56 = vpop.permute.xlu0 %227 }
  0xce   :  { %2476 = vst [vmem:[#allocation40_spill] sm:$0xff] %v1587_v62  ;;  %2477 = vst [vmem:[#allocation41_spill] sm:$0xff] %v1589_v56 }
  0xcf   :  { %520 = vperm.xlu1 %1128, %v1349_v20   ;;  %548 = vperm.xlu0 %1129, %v1392_v27  }
  0xd1   :  { %v1593_v48 = vpop.permute.xlu1 %229  ;;  %v1595_v44 = vpop.permute.xlu0 %231 }
  0xd2   :  { %2478 = vst [vmem:[#allocation42_spill] sm:$0xff] %v1595_v44  ;;  %v1191_v44 = vmov 4  }
  0xd3   :  { %528 = vperm.xlu1 %1128, %v1361_v22   ;;  %556 = vperm.xlu0 %1129, %v1404_v29  }
  0xd5   :  { %v1599_v58 = vpop.permute.xlu1 %233  ;;  %v1601_v4 = vpop.permute.xlu0 %235 }
  0xd6   :  { %2479 = vst [vmem:[#allocation43_spill] sm:$0xff] %v1601_v4 }
  0xd7   :  { %536 = vperm.xlu1 %1128, %v1373_v24   ;;  %564 = vperm.xlu0 %1129, %v1416_v31  }
  0xd9   :  { %v1605_v56 = vpop.permute.xlu1 %237  ;;  %v1607_v54 = vpop.permute.xlu0 %239 }
  0xda   :  { %2480 = vst [vmem:[#allocation44_spill] sm:$0xff] %v1607_v54 }
  0xdb   :  { %544 = vperm.xlu1 %1128, %v1385_v26   ;;  %603 = vrot.lane.b32.xlu0 %v1225_v1, %s1190_s16 }
  0xdc   :  { %1130 = vset.pattern.permute.xlu0 %v1191_v44 }
  0xdd   :  { %v1612_v53 = vpop.permute.xlu1 %241  ;;  %v1614_v52 = vpop.permute.xlu0 %243 }
  0xde   :  { %2481 = vst [vmem:[#allocation45_spill] sm:$0xff] %v1614_v52 }
  0xdf   :  { %552 = vperm.xlu1 %1128, %v1397_v28   ;;  %607 = vrot.lane.b32.xlu0 %v1220_v0, %s1190_s16 }
  0xe1   :  { %v1619_v4 = vpop.permute.xlu1 %265  ;;  %v1621_v54 = vpop.permute.xlu0 %269 }
  0xe2   :  { %2482 = vst [vmem:[#allocation46_spill] sm:$0xff] %v1619_v4  ;;  %2483 = vst [vmem:[#allocation47_spill] sm:$0xff] %v1621_v54 }
  0xe3   :  { %560 = vperm.xlu1 %1128, %v1409_v30   ;;  %611 = vrot.lane.b32.xlu0 %v1253_v6, %s1190_s16 }
  0xe5   :  { %v1626_v50 = vpop.permute.xlu1 %273  ;;  %v1628_v46 = vpop.permute.xlu0 %281 }
  0xe6   :  { %2484 = vst [vmem:[#allocation48_spill] sm:$0xff] %v1626_v50  ;;  %2485 = vst [vmem:[#allocation49_spill] sm:$0xff] %v1628_v46 }
  0xe7   :  { %568 = vperm.xlu1 %1128, %v1421_v32   ;;  %615 = vrot.lane.b32.xlu0 %v1267_v8, %s1190_s16 }
  0xe9   :  { %v1633_v52 = vpop.permute.xlu1 %277  ;;  %v1635_v42 = vpop.permute.xlu0 %289 }
  0xea   :  { %2486 = vst [vmem:[#allocation50_spill] sm:$0xff] %v1633_v52  ;;  %2487 = vst [vmem:[#allocation51_spill] sm:$0xff] %v1635_v42 }
  0xeb   :  { %605 = vrot.lane.b32.xlu1 %v1239_v3, %s1190_s16  ;;  %619 = vrot.lane.b32.xlu0 %v1281_v10, %s1190_s16 }
  0xec   :  { %1131 = vset.pattern.permute.xlu1 %v1191_v44 }
  0xed   :  { %v1641_v4 = vpop.permute.xlu1 %285  ;;  %v1643_v50 = vpop.permute.xlu0 %297 }
  0xee   :  { %2488 = vst [vmem:[#allocation52_spill] sm:$0xff] %v1641_v4 }
  0xef   :  { %609 = vrot.lane.b32.xlu1 %v1234_v2, %s1190_s16  ;;  %623 = vrot.lane.b32.xlu0 %v1295_v12, %s1190_s16 }
  0xf1   :  { %v1649_v52 = vpop.permute.xlu1 %293  ;;  %v1651_v39 = vpop.permute.xlu0 %305 }
  0xf2   :  { %2489 = vst [vmem:[#allocation53_spill] sm:$0xff] %v1649_v52 }
  0xf3   :  { %613 = vrot.lane.b32.xlu1 %v1248_v5, %s1190_s16  ;;  %627 = vrot.lane.b32.xlu0 %v1309_v14, %s1190_s16 }
  0xf5   :  { %v1657_v44 = vpop.permute.xlu1 %301  ;;  %v1659_v4 = vpop.permute.xlu0 %313 }
  0xf6   :  { %2490 = vst [vmem:[#allocation54_spill] sm:$0xff] %v1657_v44 }
  0xf7   :  { %617 = vrot.lane.b32.xlu1 %v1262_v7, %s1190_s16  ;;  %631 = vrot.lane.b32.xlu0 %v1323_v16, %s1190_s16 }
  0xf9   :  { %v1665_v35 = vpop.permute.xlu1 %309  ;;  %v1667_v52 = vpop.permute.xlu0 %321 }
  0xfa   :  { %2491 = vst [vmem:[#allocation55_spill] sm:$0xff] %v1665_v35 }
  0xfb   :  { %621 = vrot.lane.b32.xlu1 %v1276_v9, %s1190_s16  ;;  %655 = vperm.xlu0 %1130, %v1337_v18  }
  0xfd   :  { %v1672_v37 = vpop.permute.xlu1 %317  ;;  %v1674_v44 = vpop.permute.xlu0 %360 }
  0xfe   :  { %2492 = vst [vmem:[#allocation56_spill] sm:$0xff] %v1672_v37  ;;  %2493 = vst [vmem:[#allocation57_spill] sm:$0xff] %v1674_v44 }
  0xff   :  { %625 = vrot.lane.b32.xlu1 %v1290_v11, %s1190_s16  ;;  %667 = vperm.xlu0 %1130, %v1349_v20  }
 0x101   :  { %v1679_v34 = vpop.permute.xlu1 %325  ;;  %v1681_v57 = vpop.permute.xlu0 %364 }
 0x102   :  { %2494 = vst [vmem:[#allocation58_spill] sm:$0xff] %v1679_v34  ;;  %2495 = vst [vmem:[#allocation59_spill] sm:$0xff] %v1681_v57 }
 0x103   :  { %629 = vrot.lane.b32.xlu1 %v1304_v13, %s1190_s16  ;;  %675 = vperm.xlu0 %1130, %v1361_v22  }
 0x105   :  { %v1686_v35 = vpop.permute.xlu1 %362  ;;  %v1688_v42 = vpop.permute.xlu0 %368 }
 0x106   :  { %2496 = vst [vmem:[#allocation60_spill] sm:$0xff] %v1686_v35  ;;  %2497 = vst [vmem:[#allocation61_spill] sm:$0xff] %v1688_v42 }
 0x107   :  { %633 = vrot.lane.b32.xlu1 %v1318_v15, %s1190_s16  ;;  %683 = vperm.xlu0 %1130, %v1373_v24  }
 0x109   :  { %v1693_v37 = vpop.permute.xlu1 %366  ;;  %v1695_v44 = vpop.permute.xlu0 %372 }
 0x10a   :  { %2498 = vst [vmem:[#allocation62_spill] sm:$0xff] %v1693_v37  ;;  %2499 = vst [vmem:[#allocation63_spill] sm:$0xff] %v1695_v44 }
 0x10b   :  { %659 = vperm.xlu1 %1131, %v1332_v17   ;;  %691 = vperm.xlu0 %1130, %v1385_v26  }
 0x10d   :  { %v1699_v34 = vpop.permute.xlu1 %370  ;;  %v1701_v57 = vpop.permute.xlu0 %376 }
 0x10e   :  { %2500 = vst [vmem:[#allocation64_spill] sm:$0xff] %v1699_v34 }
 0x10f   :  { %663 = vperm.xlu1 %1131, %v1344_v19   ;;  %699 = vperm.xlu0 %1130, %v1397_v28  }
 0x111   :  { %v1705_v62 = vpop.permute.xlu1 %374  ;;  %v1707_v41 = vpop.permute.xlu0 %380 }
 0x112   :  { %2501 = vst [vmem:[#allocation65_spill] sm:$0xff] %v1705_v62  ;;  %v2434_v62 = vmov 5  }
 0x113   :  { %671 = vperm.xlu1 %1131, %v1356_v21   ;;  %707 = vperm.xlu0 %1130, %v1409_v30  }
 0x115   :  { %v1711_v37 = vpop.permute.xlu1 %378  ;;  %v1713_v44 = vpop.permute.xlu0 %384 }
 0x116   :  { %2502 = vst [vmem:[#allocation66_spill] sm:$0xff] %v1711_v37 }
 0x117   :  { %679 = vperm.xlu1 %1131, %v1368_v23   ;;  %715 = vperm.xlu0 %1130, %v1421_v32  }
 0x119   :  { %v1717_v34 = vpop.permute.xlu1 %382  ;;  %v1719_v42 = vpop.permute.xlu0 %388 }
 0x11a   :  { %2503 = vst [vmem:[#allocation67_spill] sm:$0xff] %v1717_v34 }
 0x11b   :  { %687 = vperm.xlu1 %1131, %v1380_v25   ;;  %752 = vrot.lane.b32.xlu0 %v1239_v3, %s1192_s25 }
 0x11c   :  { %1133 = vset.pattern.permute.xlu0 %v2434_v62 }
 0x11d   :  { %v1725_v37 = vpop.permute.xlu1 %386  ;;  %v1727_v55 = vpop.permute.xlu0 %412 }
 0x11e   :  { %2504 = vst [vmem:[#allocation68_spill] sm:$0xff] %v1725_v37  ;;  %2505 = vst [vmem:[#allocation69_spill] sm:$0xff] %v1727_v55 }
 0x11f   :  { %695 = vperm.xlu1 %1131, %v1392_v27   ;;  %756 = vrot.lane.b32.xlu0 %v1234_v2, %s1192_s25 }
 0x121   :  { %v1732_v34 = vpop.permute.xlu1 %390  ;;  %v1734_v38 = vpop.permute.xlu0 %424 }
 0x122   :  { %2506 = vst [vmem:[#allocation70_spill] sm:$0xff] %v1732_v34  ;;  %2507 = vst [vmem:[#allocation71_spill] sm:$0xff] %v1734_v38  ;;  %v2512_v34 = vmov 5  }
 0x123   :  { %703 = vperm.xlu1 %1131, %v1404_v29   ;;  %760 = vrot.lane.b32.xlu0 %v1248_v5, %s1192_s25 }
 0x125   :  { %v1739_v46 = vpop.permute.xlu1 %416  ;;  %v1741_v62 = vpop.permute.xlu0 %432 }
 0x126   :  { %2508 = vst [vmem:[#allocation72_spill] sm:$0xff] %v1739_v46  ;;  %2509 = vst [vmem:[#allocation73_spill] sm:$0xff] %v1741_v62 }
 0x127   :  { %711 = vperm.xlu1 %1131, %v1416_v31   ;;  %764 = vrot.lane.b32.xlu0 %v1262_v7, %s1192_s25 }
 0x129   :  { %v1746_v37 = vpop.permute.xlu1 %420  ;;  %v1748_v55 = vpop.permute.xlu0 %440 }
 0x12a   :  { %2510 = vst [vmem:[#allocation74_spill] sm:$0xff] %v1746_v37  ;;  %2511 = vst [vmem:[#allocation75_spill] sm:$0xff] %v1748_v55 }
 0x12b   :  { %750 = vrot.lane.b32.xlu1 %v1225_v1, %s1192_s25  ;;  %768 = vrot.lane.b32.xlu0 %v1276_v9, %s1192_s25 }
 0x12c   :  { %1132 = vset.pattern.permute.xlu1 %v2512_v34 }
 0x12d   :  { %v1755_v38 = vpop.permute.xlu1 %428  ;;  %v1757_v62 = vpop.permute.xlu0 %448 }
 0x12e   :  { %2513 = vst [vmem:[#allocation76_spill] sm:$0xff] %v1755_v38  ;;  %2514 = vst [vmem:[#allocation77_spill] sm:$0xff] %v1757_v62 }
 0x12f   :  { %754 = vrot.lane.b32.xlu1 %v1220_v0, %s1192_s25  ;;  %772 = vrot.lane.b32.xlu0 %v1290_v11, %s1192_s25 }
 0x131   :  { %v1763_v37 = vpop.permute.xlu1 %436  ;;  %v1765_v55 = vpop.permute.xlu0 %456 }
 0x132   :  { %2515 = vst [vmem:[#allocation78_spill] sm:$0xff] %v1763_v37  ;;  %2516 = vst [vmem:[#allocation79_spill] sm:$0xff] %v1765_v55 }
 0x133   :  { %758 = vrot.lane.b32.xlu1 %v1253_v6, %s1192_s25  ;;  %776 = vrot.lane.b32.xlu0 %v1304_v13, %s1192_s25 }
 0x135   :  { %v1771_v7 = vpop.permute.xlu1 %444  ;;  %v1773_v38 = vpop.permute.xlu0 %464 }
 0x136   :  { %2517 = vst [vmem:[#allocation80_spill] sm:$0xff] %v1773_v38 }
 0x137   :  { %762 = vrot.lane.b32.xlu1 %v1267_v8, %s1192_s25  ;;  %780 = vrot.lane.b32.xlu0 %v1318_v15, %s1192_s25 }
 0x139   :  { %v1779_v62 = vpop.permute.xlu1 %452  ;;  %v1781_v37 = vpop.permute.xlu0 %472 }
 0x13a   :  { %2518 = vst [vmem:[#allocation81_spill] sm:$0xff] %v1781_v37 }
 0x13b   :  { %766 = vrot.lane.b32.xlu1 %v1281_v10, %s1192_s25  ;;  %806 = vperm.xlu0 %1133, %v1332_v17  }
 0x13d   :  { %v1786_v55 = vpop.permute.xlu1 %460 }
 0x13e   :  { %v1788_v46 = vpop.permute.xlu0 %512 }
 0x13f   :  { %2519 = vst [vmem:[#allocation82_spill] sm:$0xff] %v1788_v46  ;;  %770 = vrot.lane.b32.xlu1 %v1295_v12, %s1192_s25  ;;  %818 = vperm.xlu0 %1133, %v1356_v21  }
 0x141   :  { %v1793_v38 = vpop.permute.xlu1 %468 }
 0x142   :  { %v1795_v40 = vpop.permute.xlu0 %524 }
 0x143   :  { %2520 = vst [vmem:[#allocation83_spill] sm:$0xff] %v1795_v40  ;;  %774 = vrot.lane.b32.xlu1 %v1309_v14, %s1192_s25  ;;  %826 = vperm.xlu0 %1133, %v1368_v23  }
 0x146   :  { %v1800_v37 = vpop.permute.xlu1 %508  ;;  %v1802_v51 = vpop.permute.xlu0 %532 }
 0x147   :  { %2521 = vst [vmem:[#allocation84_spill] sm:$0xff] %v1800_v37  ;;  %2522 = vst [vmem:[#allocation85_spill] sm:$0xff] %v1802_v51  ;;  %778 = vrot.lane.b32.xlu1 %v1323_v16, %s1192_s25  ;;  %834 = vperm.xlu0 %1133, %v1380_v25  }
 0x14a   :  { %v1807_v46 = vpop.permute.xlu1 %516  ;;  %v1809_v8 = vpop.permute.xlu0 %540 }
 0x14b   :  { %2523 = vst [vmem:[#allocation86_spill] sm:$0xff] %v1807_v46  ;;  %802 = vperm.xlu1 %1132, %v1337_v18   ;;  %842 = vperm.xlu0 %1133, %v1392_v27  }
 0x14e   :  { %v1813_v40 = vpop.permute.xlu1 %520  ;;  %v1815_v35 = vpop.permute.xlu0 %548 }
 0x14f   :  { %2524 = vst [vmem:[#allocation87_spill] sm:$0xff] %v1813_v40  ;;  %810 = vperm.xlu1 %1132, %v1344_v19   ;;  %846 = vperm.xlu0 %1133, %v1397_v28  }
 0x152   :  { %v1819_v37 = vpop.permute.xlu1 %528  ;;  %v1821_v51 = vpop.permute.xlu0 %556 }
 0x153   :  { %2525 = vst [vmem:[#allocation88_spill] sm:$0xff] %v1819_v37  ;;  %814 = vperm.xlu1 %1132, %v1349_v20   ;;  %850 = vperm.xlu0 %1133, %v1404_v29  }
 0x156   :  { %v1825_v46 = vpop.permute.xlu1 %536  ;;  %v1827_v54 = vpop.permute.xlu0 %564 }
 0x157   :  { %2526 = vst [vmem:[#allocation89_spill] sm:$0xff] %v1825_v46  ;;  %822 = vperm.xlu1 %1132, %v1361_v22   ;;  %899 = vrot.lane.b32.xlu0 %v1239_v3, %s1194_s26 }
 0x15a   :  { %v1832_v40 = vpop.permute.xlu1 %544  ;;  %v604_v60 = vpop.permute.xlu0 %603 }
 0x15b   :  { %2527 = vst [vmem:[#allocation90_spill] sm:$0xff] %v1832_v40  ;;  %830 = vperm.xlu1 %1132, %v1373_v24   ;;  %915 = vrot.lane.b32.xlu0 %v1276_v9, %s1194_s26  ;;  %v2440_v40 = vmov 6  }
 0x15e   :  { %v1837_v37 = vpop.permute.xlu1 %552  ;;  %v1839_v36 = vpop.permute.xlu0 %607 }
 0x15f   :  { %2528 = vst [vmem:[#allocation91_spill] sm:$0xff] %v1837_v37  ;;  %838 = vperm.xlu1 %1132, %v1385_v26   ;;  %901 = vrot.lane.b32.xlu0 %v1220_v0, %s1194_s26 }
 0x162   :  { %v1844_v46 = vpop.permute.xlu1 %560  ;;  %v1846_v3 = vpop.permute.xlu0 %611 }
 0x163   :  { %2529 = vst [vmem:[#allocation92_spill] sm:$0xff] %v1844_v46  ;;  %1134 = vset.pattern.permute.xlu1 %v2440_v40  ;;  %862 = vperm.xlu0 %1133, %v1421_v32  }
 0x164   :  { %949 = vperm.xlu1 %1134, %v1337_v18  }
 0x166   :  { %v1851_v9 = vpop.permute.xlu1 %568  ;;  %v1853_v37 = vpop.permute.xlu0 %615 }
 0x167   :  { %2530 = vst [vmem:[#allocation93_spill] sm:$0xff] %v1851_v9  ;;  %1139 = vset.pattern.permute.xlu0 %v2440_v40 }
 0x168   :  { %981 = vperm.xlu1 %1134, %v1380_v25   ;;  %953 = vperm.xlu0 %1139, %v1332_v17   ;;  %v32_v17 = vlaneseq }
 0x16a   :  { %v1858_v0 = vpop.permute.xlu1 %605  ;;  %v1860_v46 = vpop.permute.xlu0 %619 }
 0x16b   :  { %2531 = vst [vmem:[#allocation94_spill] sm:$0xff] %v1858_v0 }
 0x16c   :  { %985 = vperm.xlu1 %1134, %v1385_v26   ;;  %993 = vperm.xlu0 %1139, %v1397_v28   ;;  %v1876_v28 = vand.u32 127, %v32_v17 }
 0x16e   :  { %v1864_v5 = vpop.permute.xlu1 %609  ;;  %v1866_v18 = vpop.permute.xlu0 %623  ;;  %vm635_vm0 = vcmp.lt.s32.totalorder %v1876_v28, 127  ;;  %vm245_vm1 = vcmp.ge.s32.totalorder %v1876_v28, 2  ;;  %vm66_vm2 = vcmp.ge.s32.totalorder %v1876_v28, 3  ;;  %vm392_vm3 = vcmp.ge.s32.totalorder %v1876_v28, 1 }
 0x16f   :  { %2532 = vst [vmem:[#allocation95_spill] sm:$0xff] %v1864_v5  ;;  %vm782_vm4 = vcmp.lt.s32.totalorder %v1876_v28, 126  ;;  %vm929_vm5 = vcmp.lt.s32.totalorder %v1876_v28, 125 }
 0x170   :  { %957 = vperm.xlu1 %1134, %v1344_v19   ;;  %997 = vperm.xlu0 %1139, %v1404_v29   ;;  %v638_v19 = vsel %vm635_vm0, %v604_v60, 0.0  ;;  %v2534_v60 = vmov 6  }
 0x172   :  { %v614_v40 = vpop.permute.xlu1 %613  ;;  %v1870_v25 = vpop.permute.xlu0 %627 }
 0x174   :  { %989 = vperm.xlu1 %1134, %v1392_v27   ;;  %969 = vperm.xlu0 %1139, %v1361_v22  }
 0x176   :  { %v618_v9 = vpop.permute.xlu1 %617  ;;  %v1874_v26 = vpop.permute.xlu0 %631 }
 0x178   :  { %961 = vperm.xlu1 %1134, %v1349_v20   ;;  %973 = vperm.xlu0 %1139, %v1368_v23   ;;  %v643_v23 = vsel %vm635_vm0, %v614_v40, 0.0 }
 0x17a   :  { %v622_v29 = vpop.permute.xlu1 %621  ;;  %v656_v5 = vpop.permute.xlu0 %655 }
 0x17b   :  { %v1883_v0 = vmul.f32 %v656_v5, %v638_v19  ;;  %v647_v40 = vsel %vm635_vm0, %v622_v29, 0.0 }
 0x17c   :  { %1135 = vset.pattern.permute.xlu1 %v2512_v34  ;;  %921 = vrot.lane.b32.xlu0 %v1309_v14, %s1194_s26 }
 0x17d   :  { %854 = vperm.xlu1 %1135, %v1409_v30  }
 0x17e   :  { %v626_v22 = vpop.permute.xlu1 %625  ;;  %v1889_v20 = vpop.permute.xlu0 %667 }
 0x17f   :  { %2533 = vst [vmem:[#allocation96_spill] sm:$0xff] %v1889_v20 }
 0x180   :  { %1009 = vperm.xlu0 %1139, %v1421_v32   ;;  %v645_v32 = vsel %vm635_vm0, %v618_v9, 0.0  ;;  %v640_v9 = vsel %vm635_vm0, %v1839_v36, 0.0  ;;  %v642_v36 = vsel %vm635_vm0, %v1846_v3, 0.0 }
 0x181   :  { %897 = vrot.lane.b32.xlu1 %v1225_v1, %s1194_s26 }
 0x182   :  { %v630_v5 = vpop.permute.xlu1 %629  ;;  %v676_v27 = vpop.permute.xlu0 %675  ;;  %1136 = vset.pattern.permute.xlu1 %v2534_v60 }
 0x183   :  { %v1897_v17 = vmul.f32 %v676_v27, %v643_v23 }
 0x184   :  { %923 = vrot.lane.b32.xlu0 %v1304_v13, %s1194_s26 }
 0x185   :  { %913 = vrot.lane.b32.xlu1 %v1281_v10, %s1194_s26 }
 0x186   :  { %v634_v19 = vpop.permute.xlu1 %633  ;;  %v684_v1 = vpop.permute.xlu0 %683 }
 0x187   :  { %v1905_v20 = vmul.f32 %v684_v1, %v645_v32 }
 0x188   :  { %925 = vrot.lane.b32.xlu0 %v1323_v16, %s1194_s26 }
 0x189   :  { %965 = vperm.xlu1 %1136, %v1356_v21   ;;  %v649_v21 = vsel %vm635_vm0, %v626_v22, 0.0  ;;  %v651_v22 = vsel %vm635_vm0, %v630_v5, 0.0  ;;  %v403_v5 = vsel %vm392_vm3, %v1701_v57, 0.0 }
 0x18a   :  { %v1912_v23 = vpop.permute.xlu1 %659  ;;  %v692_v13 = vpop.permute.xlu0 %691 }
 0x18b   :  { %v1914_v27 = vmul.f32 %v692_v13, %v647_v40 }
 0x18c   :  { %927 = vrot.lane.b32.xlu0 %v1318_v15, %s1194_s26  ;;  %v256_v15 = vsel %vm245_vm1, %v1593_v48, 0.0  ;;  %v77_v48 = vsel %vm66_vm2, %v1481_v43, 0.0  ;;  %v258_v43 = vsel %vm245_vm1, %v1599_v58, 0.0 }
 0x18d   :  { %1137 = vset.pattern.permute.xlu1 %v2512_v34  ;;  %v336_v34 = vmul.f32 %v1643_v50, %v256_v15  ;;  %v189_v3 = vmul.f32 %v1545_v59, %v77_v48  ;;  %v644_v15 = vsel %vm635_vm0, %v1853_v37, 0.0  ;;  %v338_v57 = vmul.f32 %v1651_v39, %v258_v43 }
 0x18e   :  { %858 = vperm.xlu1 %1137, %v1416_v31   ;;  %v664_v29 = vpop.permute.xlu1 %663  ;;  %v700_v32 = vpop.permute.xlu0 %699  ;;  %v79_v37 = vsel %vm66_vm2, %v1493_v45, 0.0  ;;  %v260_v39 = vsel %vm245_vm1, %v1605_v56, 0.0  ;;  %v646_v45 = vsel %vm635_vm0, %v1860_v46, 0.0  ;;  %v583_v43 = vmul.f32 %v1821_v51, %v1309_v14 }
 0x18f   :  { %v1925_v1 = vmul.f32 %v664_v29, %v640_v9  ;;  %v1927_v40 = vmul.f32 %v700_v32, %v649_v21  ;;  %v483_v29 = vmul.f32 %v1771_v7, %v403_v5  ;;  %v352_v32 = vadd.f32 %v336_v34, %v189_v3 }
 0x190   :  { %v579_v7 = vmul.f32 %v1809_v8, %v1281_v10  ;;  %v81_v10 = vsel %vm66_vm2, %v1501_v47, 0.0  ;;  %v650_v14 = vsel %vm635_vm0, %v1870_v25, 0.0 }
 0x191   :  { %v499_v34 = vadd.f32 %v483_v29, %v352_v32  ;;  %v193_v47 = vmul.f32 %v1557_v63, %v81_v10  ;;  %v2537_v10 = vld [vmem:[#allocation35_spill] sm:$0xff] }
 0x192   :  { %917 = vrot.lane.b32.xlu1 %v1295_v12, %s1194_s26  ;;  %v672_v13 = vpop.permute.xlu1 %671  ;;  %v708_v9 = vpop.permute.xlu0 %707 }
 0x193   :  { %v1946_v21 = vmul.f32 %v672_v13, %v642_v36  ;;  %v1948_v50 = vmul.f32 %v708_v9, %v651_v22  ;;  %1138 = vset.pattern.permute.xlu1 %v2534_v60  ;;  %v653_v60 = vsel %vm635_vm0, %v634_v19, 0.0  ;;  %v405_v19 = vsel %vm392_vm3, %v1707_v41, 0.0 }
 0x194   :  { %v485_v8 = vmul.f32 %v1779_v62, %v405_v19  ;;  %v340_v13 = vmul.f32 %v1659_v4, %v260_v39  ;;  %v595_v9 = vadd.f32 %v579_v7, %v499_v34  ;;  %v581_v62 = vmul.f32 %v1815_v35, %v1295_v12 }
 0x195   :  { %v407_v4 = vsel %vm392_vm3, %v1713_v44, 0.0  ;;  %v648_v12 = vsel %vm635_vm0, %v1866_v18, 0.0  ;;  %v409_v18 = vsel %vm392_vm3, %v1719_v42, 0.0  ;;  %v585_v42 = vmul.f32 %v1827_v54, %v1323_v16 }
 0x196   :  { %1001 = vperm.xlu1 %1138, %v1409_v30   ;;  %v680_v59 = vpop.permute.xlu1 %679  ;;  %v716_v36 = vpop.permute.xlu0 %715  ;;  %v191_v30 = vmul.f32 %v1551_v61, %v79_v37  ;;  %v487_v46 = vmul.f32 %v1786_v55, %v407_v4  ;;  %v356_v29 = vadd.f32 %v340_v13, %v193_v47  ;;  %v249_v13 = vsel %vm245_vm1, %v2537_v10, 0.0  ;;  %v2541_v47 = vld [vmem:[#allocation22_spill] sm:$0xff] }
 0x197   :  { %v1968_v22 = vmul.f32 %v680_v59, %v644_v15  ;;  %v1970_v58 = vmul.f32 %v716_v36, %v653_v60  ;;  %v489_v60 = vmul.f32 %v1793_v38, %v409_v18  ;;  %v652_v38 = vsel %vm635_vm0, %v1874_v26, 0.0  ;;  %v2535_v26 = vld [vmem:[#allocation7_spill] sm:$0xff] }
 0x198   :  { %v354_v56 = vadd.f32 %v338_v57, %v191_v30  ;;  %v503_v15 = vadd.f32 %v487_v46, %v356_v29 }
 0x19a   :  { %903 = vrot.lane.b32.xlu1 %v1234_v2, %s1194_s26  ;;  %v688_v41 = vpop.permute.xlu1 %687  ;;  %v1992_v61 = vpop.permute.xlu0 %752  ;;  %v501_v3 = vadd.f32 %v485_v8, %v354_v56  ;;  %v262_v2 = vsel %vm245_vm1, %v1612_v53, 0.0  ;;  %v83_v53 = vsel %vm66_vm2, %v1513_v49, 0.0  ;;  %v599_v36 = vadd.f32 %v583_v43, %v503_v15 }
 0x19b   :  { %v726_v48 = vmul.f32 %v688_v41, %v646_v45  ;;  %v342_v44 = vmul.f32 %v1667_v52, %v262_v2  ;;  %v2539_v41 = vld [vmem:[#allocation60_spill] sm:$0xff] }
 0x19c   :  { %v597_v55 = vadd.f32 %v581_v62, %v501_v3  ;;  %v396_v56 = vsel %vm392_vm3, %v2539_v41, 0.0  ;;  %v2542_v3 = vld [vmem:[#allocation38_spill] sm:$0xff]  ;;  %v2543_v2 = vld [vmem:[#allocation72_spill] sm:$0xff] }
 0x19d   :  { %v2001_v5 = vadd.f32 %v726_v48, %v595_v9  ;;  %v2540_v48 = vld [vmem:[#allocation9_spill] sm:$0xff]  ;;  %v252_v46 = vsel %vm245_vm1, %v2542_v3, 0.0  ;;  %v476_v29 = vmul.f32 %v2543_v2, %v396_v56  ;;  %v2556_v56 = vld [vmem:[#allocation83_spill] sm:$0xff] }
 0x19e   :  { %919 = vrot.lane.b32.xlu1 %v1290_v11, %s1194_s26  ;;  %v696_v35 = vpop.permute.xlu1 %695  ;;  %v2011_v63 = vpop.permute.xlu0 %756  ;;  %v195_v11 = vmul.f32 %v1563_v33, %v83_v53  ;;  %v2547_v53 = vld [vmem:[#allocation82_spill] sm:$0xff] }
 0x19f   :  { %v728_v32 = vmul.f32 %v696_v35, %v648_v12  ;;  %v2544_v12 = vld [vmem:[#allocation49_spill] sm:$0xff] }
 0x1a0   :  { %v358_v49 = vadd.f32 %v342_v44, %v195_v11  ;;  %v332_v35 = vmul.f32 %v2544_v12, %v252_v46  ;;  %v2545_v44 = vld [vmem:[#allocation14_spill] sm:$0xff]  ;;  %v786_v46 = vsel %vm782_vm4, %v1992_v61, 0.0 }
 0x1a1   :  { %v2024_v59 = vadd.f32 %v728_v32, %v597_v55  ;;  %v73_v55 = vsel %vm66_vm2, %v2545_v44, 0.0  ;;  %v2546_v32 = vld [vmem:[#allocation6_spill] sm:$0xff] }
 0x1a2   :  { %1005 = vperm.xlu1 %1138, %v1416_v31   ;;  %v704_v51 = vpop.permute.xlu1 %703  ;;  %v2030_v52 = vpop.permute.xlu0 %760  ;;  %v505_v57 = vadd.f32 %v489_v60, %v358_v49  ;;  %v572_v18 = vmul.f32 %v2547_v53, %v2546_v32  ;;  %v2548_v11 = vld [vmem:[#allocation26_spill] sm:$0xff]  ;;  %v2549_v60 = vld [vmem:[#allocation61_spill] sm:$0xff] }
 0x1a3   :  { %v730_v33 = vmul.f32 %v704_v51, %v650_v14  ;;  %v185_v15 = vmul.f32 %v2548_v11, %v73_v55  ;;  %v399_v14 = vsel %vm392_vm3, %v2549_v60, 0.0  ;;  %v2550_v51 = vld [vmem:[#allocation94_spill] sm:$0xff] }
 0x1a4   :  { %v601_v37 = vadd.f32 %v585_v42, %v505_v57  ;;  %v639_v49 = vsel %vm635_vm0, %v2550_v51, 0.0  ;;  %v1148_v41 = vld [vmem:[%s2430_s0 + $0x20] sm:$0xff]  ;;  %v1149_v51 = vld [vmem:[%s2430_s0 + $0x30] sm:$0xff] }
 0x1a5   :  { %v2034_v7 = vadd.f32 %v730_v33, %v599_v36  ;;  %v2551_v33 = vld [vmem:[#allocation8_spill] sm:$0xff]  ;;  %v348_v10 = vadd.f32 %v332_v35, %v185_v15  ;;  %v2559_v35 = vld [vmem:[#allocation78_spill] sm:$0xff]  ;;  %v2562_v15 = vld [vmem:[#allocation11_spill] sm:$0xff] }
 0x1a6   :  { %905 = vrot.lane.b32.xlu1 %v1253_v6, %s1194_s26  ;;  %v712_v31 = vpop.permute.xlu1 %711  ;;  %v2041_v25 = vpop.permute.xlu0 %764  ;;  %v2536_v6 = vld [vmem:[#allocation12_spill] sm:$0xff]  ;;  %v2560_v32 = vld [vmem:[#allocation10_spill] sm:$0xff]  ;;  %v69_v60 = vsel %vm66_vm2, %v2562_v15, 0.0 }
 0x1a7   :  { %v732_v19 = vmul.f32 %v712_v31, %v652_v38  ;;  %v70_v8 = vsel %vm66_vm2, %v2536_v6, 0.0  ;;  %v2552_v38 = vld [vmem:[#allocation76_spill] sm:$0xff]  ;;  %v71_v53 = vsel %vm66_vm2, %v2560_v32, 0.0 }
 0x1a8   :  { %v182_v4 = vmul.f32 %v2541_v47, %v70_v8  ;;  %v479_v31 = vmul.f32 %v2552_v38, %v399_v14  ;;  %v2554_v6 = vld [vmem:[#allocation40_spill] sm:$0xff]  ;;  %v2564_v38 = vld [vmem:[#allocation15_spill] sm:$0xff] }
 0x1a9   :  { %v2043_v30 = vadd.f32 %v732_v19, %v601_v37  ;;  %v719_v37 = vmul.f32 %v1912_v23, %v639_v49  ;;  %v2553_v19 = vld [vmem:[#allocation16_spill] sm:$0xff]  ;;  %v254_v8 = vsel %vm245_vm1, %v2554_v6, 0.0  ;;  %v2563_v49 = vld [vmem:[#allocation85_spill] sm:$0xff] }
 0x1aa   :  { %977 = vperm.xlu1 %1138, %v1373_v24   ;;  %v2046_v16 = vpop.permute.xlu1 %750  ;;  %v2048_v54 = vpop.permute.xlu0 %768  ;;  %v2538_v24 = vld [vmem:[#allocation47_spill] sm:$0xff]  ;;  %v2557_v23 = vld [vmem:[#allocation28_spill] sm:$0xff]  ;;  %v495_v12 = vadd.f32 %v479_v31, %v348_v10  ;;  %v74_v31 = vsel %vm66_vm2, %v2564_v38, 0.0 }
 0x1ab   :  { %v329_v45 = vmul.f32 %v2538_v24, %v249_v13  ;;  %v2555_v13 = vld [vmem:[#allocation51_spill] sm:$0xff] }
 0x1ac   :  { %v334_v24 = vmul.f32 %v2555_v13, %v254_v8 }
 0x1ad   :  { %v345_v43 = vadd.f32 %v329_v45, %v182_v4  ;;  %v2558_v4 = vld [vmem:[#allocation63_spill] sm:$0xff] }
 0x1ae   :  { %v2050_v39 = vpop.permute.xlu1 %754  ;;  %v2052_v34 = vpop.permute.xlu0 %772  ;;  %907 = vrot.lane.b32.xlu1 %v2535_v26, %s1194_s26  ;;  %v75_v26 = vsel %vm66_vm2, %v2553_v19, 0.0  ;;  %v401_v3 = vsel %vm392_vm3, %v2558_v4, 0.0  ;;  %v2569_v4 = vld [vmem:[#allocation24_spill] sm:$0xff] }
 0x1af   :  { %v492_v57 = vadd.f32 %v476_v29, %v345_v43  ;;  %v187_v47 = vmul.f32 %v2557_v23, %v75_v26  ;;  %v481_v44 = vmul.f32 %v2559_v35, %v401_v3  ;;  %v2566_v26 = vld [vmem:[#allocation19_spill] sm:$0xff]  ;;  %v183_v3 = vmul.f32 %v2569_v4, %v71_v53 }
 0x1b0   :  { %v80_v6 = vsel %vm66_vm2, %v2566_v26, 0.0  ;;  %v2568_v23 = vld [vmem:[#allocation23_spill] sm:$0xff] }
 0x1b1   :  { %v588_v45 = vadd.f32 %v572_v18, %v492_v57  ;;  %v2561_v18 = vld [vmem:[#allocation13_spill] sm:$0xff]  ;;  %v350_v61 = vadd.f32 %v334_v24, %v187_v47  ;;  %v2567_v24 = vld [vmem:[#allocation34_spill] sm:$0xff]  ;;  %v181_v47 = vmul.f32 %v2568_v23, %v69_v60  ;;  %v2583_v4 = vld [vmem:[#allocation59_spill] sm:$0xff] }
 0x1b2   :  { %v759_v9 = vpop.permute.xlu1 %758  ;;  %v2066_v62 = vpop.permute.xlu0 %776  ;;  %909 = vrot.lane.b32.xlu1 %v2540_v48, %s1194_s26  ;;  %v575_v48 = vmul.f32 %v1148_v41, %v2556_v56  ;;  %v72_v11 = vsel %vm66_vm2, %v2561_v18, 0.0  ;;  %v2576_v60 = vld [vmem:[#allocation57_spill] sm:$0xff] }
 0x1b3   :  { %v735_v55 = vadd.f32 %v719_v37, %v588_v45  ;;  %v2565_v37 = vld [vmem:[#allocation17_spill] sm:$0xff]  ;;  %v789_v8 = vsel %vm782_vm4, %v759_v9, 0.0  ;;  %v248_v45 = vsel %vm245_vm1, %v2567_v24, 0.0  ;;  %v497_v41 = vadd.f32 %v481_v44, %v350_v61  ;;  %v2574_v44 = vld [vmem:[#allocation36_spill] sm:$0xff] }
 0x1b4   :  { %v591_v14 = vadd.f32 %v575_v48, %v495_v12  ;;  %v2135_v19 = vsel %vm66_vm2, %v2565_v37, 0.0  ;;  %v2571_v12 = vld [vmem:[#allocation46_spill] sm:$0xff]  ;;  %v2575_v61 = vld [vmem:[#allocation37_spill] sm:$0xff] }
 0x1b5   :  { %v328_v35 = vmul.f32 %v2571_v12, %v248_v45  ;;  %v251_v53 = vsel %vm245_vm1, %v2575_v61, 0.0  ;;  %v2580_v45 = vld [vmem:[#allocation48_spill] sm:$0xff] }
 0x1b6   :  { %v763_v36 = vpop.permute.xlu1 %762  ;;  %v2088_v42 = vpop.permute.xlu0 %780  ;;  %911 = vrot.lane.b32.xlu1 %v2551_v33, %s1194_s26  ;;  %v577_v33 = vmul.f32 %v1149_v51, %v2563_v49  ;;  %v738_v56 = vadd.f32 %v1946_v21, %v591_v14  ;;  %v250_v21 = vsel %vm245_vm1, %v2574_v44, 0.0  ;;  %v2584_v12 = vld [vmem:[#allocation84_spill] sm:$0xff] }
 0x1b7   :  { %v791_v14 = vsel %vm782_vm4, %v763_v36, 0.0  ;;  %v344_v24 = vadd.f32 %v328_v35, %v181_v47  ;;  %v2581_v36 = vld [vmem:[#allocation50_spill] sm:$0xff]  ;;  %v2586_v35 = vld [vmem:[#allocation67_spill] sm:$0xff] }
 0x1b8   :  { %v593_v18 = vadd.f32 %v577_v33, %v497_v41  ;;  %v2577_v33 = vld [vmem:[#allocation39_spill] sm:$0xff]  ;;  %v330_v41 = vmul.f32 %v2580_v45, %v250_v21  ;;  %v406_v44 = vsel %vm392_vm3, %v2586_v35, 0.0  ;;  %v2587_v21 = vld [vmem:[#allocation74_spill] sm:$0xff] }
 0x1b9   :  { %v253_v38 = vsel %vm245_vm1, %v2577_v33, 0.0  ;;  %v2590_v45 = vld [vmem:[#allocation71_spill] sm:$0xff] }
 0x1ba   :  { %v767_v2 = vpop.permute.xlu1 %766  ;;  %v807_v29 = vpop.permute.xlu0 %806  ;;  %v740_v26 = vadd.f32 %v1968_v22, %v593_v18  ;;  %v1150_v22 = vld [vmem:[%s2430_s0] sm:$0xff] }
 0x1bb   :  { %v866_v43 = vmul.f32 %v807_v29, %v786_v46  ;;  %v2570_v46 = vld [vmem:[#allocation25_spill] sm:$0xff] }
 0x1bc   :  { %v184_v29 = vmul.f32 %v2570_v46, %v72_v11  ;;  %v395_v11 = vsel %vm392_vm3, %v2576_v60, 0.0  ;;  %v397_v46 = vsel %vm392_vm3, %v2583_v4, 0.0  ;;  %v2585_v18 = vld [vmem:[#allocation41_spill] sm:$0xff] }
 0x1bd   :  { %v2127_v57 = vadd.f32 %v866_v43, %v735_v55  ;;  %v2572_v55 = vld [vmem:[#allocation27_spill] sm:$0xff]  ;;  %v255_v47 = vsel %vm245_vm1, %v2585_v18, 0.0  ;;  %v477_v61 = vmul.f32 %v2587_v21, %v397_v46 }
 0x1be   :  { %v771_v10 = vpop.permute.xlu1 %770  ;;  %v819_v13 = vpop.permute.xlu0 %818  ;;  %v2151_v9 = vmul.f32 %v2572_v55, %v74_v31  ;;  %v2573_v43 = vld [vmem:[#allocation31_spill] sm:$0xff]  ;;  %v2578_v31 = vld [vmem:[#allocation69_spill] sm:$0xff]  ;;  %v571_v55 = vmul.f32 %v1150_v22, %v2584_v12 }
 0x1bf   :  { %v869_v48 = vmul.f32 %v819_v13, %v789_v8  ;;  %v192_v32 = vmul.f32 %v2573_v43, %v80_v6  ;;  %v475_v37 = vmul.f32 %v2578_v31, %v395_v11  ;;  %v2579_v8 = vld [vmem:[#allocation43_spill] sm:$0xff]  ;;  %v1152_v12 = vld [vmem:[%s2430_s0 + $0x58] sm:$0xff] }
 0x1c0   :  { %v259_v13 = vsel %vm245_vm1, %v2579_v8, 0.0  ;;  %v2589_v31 = vld [vmem:[#allocation79_spill] sm:$0xff]  ;;  %v346_v8 = vadd.f32 %v330_v41, %v183_v3  ;;  %v2593_v3 = vld [vmem:[#allocation52_spill] sm:$0xff] }
 0x1c1   :  { %v2154_v15 = vadd.f32 %v869_v48, %v738_v56  ;;  %v331_v56 = vmul.f32 %v2581_v36, %v251_v53  ;;  %v2582_v48 = vld [vmem:[#allocation55_spill] sm:$0xff]  ;;  %v793_v53 = vsel %vm782_vm4, %v767_v2, 0.0  ;;  %v491_v33 = vadd.f32 %v475_v37, %v344_v24  ;;  %v2591_v2 = vld [vmem:[#allocation86_spill] sm:$0xff] }
 0x1c2   :  { %v2167_v51 = vpop.permute.xlu1 %774  ;;  %v827_v49 = vpop.permute.xlu0 %826  ;;  %v339_v23 = vmul.f32 %v2582_v48, %v259_v13  ;;  %v1151_v48 = vld [vmem:[%s2430_s0 + $0x10] sm:$0xff]  ;;  %v493_v41 = vadd.f32 %v477_v61, %v346_v8 }
 0x1c3   :  { %v871_v6 = vmul.f32 %v827_v49, %v791_v14  ;;  %v2588_v14 = vld [vmem:[#allocation62_spill] sm:$0xff]  ;;  %v347_v13 = vadd.f32 %v331_v56, %v184_v29  ;;  %v573_v4 = vmul.f32 %v1151_v48, %v2591_v2  ;;  %v587_v22 = vadd.f32 %v571_v55, %v491_v33  ;;  %v2592_v37 = vld [vmem:[#allocation91_spill] sm:$0xff] }
 0x1c4   :  { %v398_v49 = vsel %vm392_vm3, %v2588_v14, 0.0  ;;  %v355_v46 = vadd.f32 %v339_v23, %v192_v32  ;;  %v582_v24 = vmul.f32 %v1152_v12, %v2592_v37  ;;  %v333_v29 = vmul.f32 %v2593_v3, %v253_v38  ;;  %v2595_v14 = vld [vmem:[#allocation87_spill] sm:$0xff]  ;;  %v2599_v37 = vld [vmem:[#allocation29_spill] sm:$0xff]  ;;  %v2600_v3 = vld [vmem:[#allocation42_spill] sm:$0xff] }
 0x1c5   :  { %v2187_v43 = vadd.f32 %v871_v6, %v740_v26  ;;  %v486_v26 = vmul.f32 %v2589_v31, %v406_v44  ;;  %v478_v36 = vmul.f32 %v2590_v45, %v398_v49  ;;  %v785_v56 = vsel %vm782_vm4, %v2046_v16, 0.0  ;;  %v1153_v16 = vld [vmem:[%s2430_s0 + $0x18] sm:$0xff]  ;;  %v2596_v33 = vld [vmem:[#allocation95_spill] sm:$0xff] }
 0x1c6   :  { %v2198_v60 = vpop.permute.xlu1 %778  ;;  %v835_v11 = vpop.permute.xlu0 %834  ;;  %v795_v32 = vsel %vm782_vm4, %v771_v10, 0.0  ;;  %v734_v44 = vadd.f32 %v1883_v0, %v587_v22  ;;  %v589_v61 = vadd.f32 %v573_v4, %v493_v41  ;;  %v574_v49 = vmul.f32 %v1153_v16, %v2595_v14  ;;  %v2605_v14 = vld [vmem:[#allocation18_spill] sm:$0xff] }
 0x1c7   :  { %v873_v6 = vmul.f32 %v835_v11, %v793_v53  ;;  %v502_v35 = vadd.f32 %v486_v26, %v355_v46  ;;  %v2594_v11 = vld [vmem:[#allocation64_spill] sm:$0xff]  ;;  %v494_v38 = vadd.f32 %v478_v36, %v347_v13  ;;  %v641_v31 = vsel %vm635_vm0, %v2596_v33, 0.0  ;;  %v2606_v33 = vld [vmem:[#allocation54_spill] sm:$0xff] }
 0x1c8   :  { %v2598_v13 = vld [vmem:[#allocation96_spill] sm:$0xff]  ;;  %v787_v36 = vsel %vm782_vm4, %v2050_v39, 0.0  ;;  %v796_v48 = vsel %vm782_vm4, %v2052_v34, 0.0  ;;  %v736_v46 = vadd.f32 %v1925_v1, %v589_v61  ;;  %v257_v41 = vsel %vm245_vm1, %v2600_v3, 0.0  ;;  %v1154_v1 = vld [vmem:[%s2430_s0 + $0x28] sm:$0xff] }
 0x1c9   :  { %v2214_v18 = vadd.f32 %v873_v6, %v2001_v5  ;;  %v400_v5 = vsel %vm392_vm3, %v2594_v11, 0.0  ;;  %v598_v10 = vadd.f32 %v582_v24, %v502_v35  ;;  %v2597_v6 = vld [vmem:[#allocation73_spill] sm:$0xff]  ;;  %v721_v45 = vmul.f32 %v2598_v13, %v641_v31  ;;  %v2604_v11 = vld [vmem:[#allocation75_spill] sm:$0xff] }
 0x1ca   :  { %v803_v23 = vpop.permute.xlu1 %802  ;;  %v843_v55 = vpop.permute.xlu0 %842  ;;  %v480_v8 = vmul.f32 %v2597_v6, %v400_v5  ;;  %v188_v24 = vmul.f32 %v2599_v37, %v2135_v19  ;;  %v349_v39 = vadd.f32 %v333_v29, %v2151_v9  ;;  %v590_v34 = vadd.f32 %v574_v49, %v494_v38  ;;  %v2603_v19 = vld [vmem:[#allocation65_spill] sm:$0xff] }
 0x1cb   :  { %v865_v21 = vmul.f32 %v803_v23, %v785_v56  ;;  %v875_v53 = vmul.f32 %v843_v55, %v795_v32  ;;  %v745_v22 = vadd.f32 %v1927_v40, %v598_v10  ;;  %v2601_v56 = vld [vmem:[#allocation53_spill] sm:$0xff]  ;;  %v2602_v23 = vld [vmem:[#allocation88_spill] sm:$0xff]  ;;  %v788_v9 = vsel %vm782_vm4, %v2011_v63, 0.0 }
 0x1cc   :  { %v335_v32 = vmul.f32 %v2601_v56, %v255_v47  ;;  %v576_v40 = vmul.f32 %v1154_v1, %v2602_v23  ;;  %v797_v47 = vsel %vm782_vm4, %v2167_v51, 0.0  ;;  %v737_v38 = vadd.f32 %v721_v45, %v590_v34  ;;  %v1155_v63 = vld [vmem:[%s2430_s0 + $0x38] sm:$0xff]  ;;  %v2613_v1 = vld [vmem:[#allocation58_spill] sm:$0xff] }
 0x1cd   :  { %v2233_v0 = vadd.f32 %v865_v21, %v734_v44  ;;  %v2236_v26 = vadd.f32 %v875_v53, %v2024_v59  ;;  %v402_v44 = vsel %vm392_vm3, %v2603_v19, 0.0  ;;  %v496_v21 = vadd.f32 %v480_v8, %v349_v39  ;;  %v2607_v51 = vld [vmem:[#allocation89_spill] sm:$0xff]  ;;  %v2614_v19 = vld [vmem:[#allocation90_spill] sm:$0xff] }
 0x1ce   :  { %v811_v2 = vpop.permute.xlu1 %810  ;;  %v847_v4 = vpop.permute.xlu0 %846  ;;  %v482_v5 = vmul.f32 %v2604_v11, %v402_v44  ;;  %v78_v49 = vsel %vm66_vm2, %v2605_v14, 0.0  ;;  %v351_v10 = vadd.f32 %v335_v32, %v188_v24  ;;  %v337_v31 = vmul.f32 %v2606_v33, %v257_v41  ;;  %v2610_v37 = vld [vmem:[#allocation77_spill] sm:$0xff] }
 0x1cf   :  { %v867_v59 = vmul.f32 %v811_v2, %v787_v36  ;;  %v876_v12 = vmul.f32 %v847_v4, %v796_v48  ;;  %v592_v6 = vadd.f32 %v576_v40, %v496_v21  ;;  %v578_v8 = vmul.f32 %v1155_v63, %v2607_v51  ;;  %v2608_v36 = vld [vmem:[#allocation30_spill] sm:$0xff]  ;;  %v2611_v41 = vld [vmem:[#allocation21_spill] sm:$0xff] }
 0x1d0   :  { %v190_v48 = vmul.f32 %v2608_v36, %v78_v49  ;;  %v2609_v2 = vld [vmem:[#allocation66_spill] sm:$0xff]  ;;  %v84_v39 = vsel %vm66_vm2, %v2611_v41, 0.0  ;;  %v2612_v56 = vld [vmem:[#allocation45_spill] sm:$0xff] }
 0x1d1   :  { %v2259_v55 = vadd.f32 %v867_v59, %v736_v46  ;;  %v2261_v35 = vadd.f32 %v876_v12, %v745_v22  ;;  %v404_v4 = vsel %vm392_vm3, %v2609_v2, 0.0  ;;  %v790_v46 = vsel %vm782_vm4, %v2030_v52, 0.0  ;;  %v1156_v40 = vld [vmem:[%s2430_s0 + $0x48] sm:$0xff]  ;;  %v2615_v21 = vld [vmem:[#allocation33_spill] sm:$0xff] }
 0x1d2   :  { %v815_v29 = vpop.permute.xlu1 %814  ;;  %v851_v53 = vpop.permute.xlu0 %850  ;;  %v498_v12 = vadd.f32 %v482_v5, %v351_v10  ;;  %v484_v24 = vmul.f32 %v2610_v37, %v404_v4  ;;  %v739_v3 = vadd.f32 %v1897_v17, %v592_v6  ;;  %v263_v32 = vsel %vm245_vm1, %v2612_v56, 0.0  ;;  %v2618_v6 = vld [vmem:[#allocation93_spill] sm:$0xff] }
 0x1d3   :  { %v868_v61 = vmul.f32 %v815_v29, %v788_v9  ;;  %v877_v16 = vmul.f32 %v851_v53, %v797_v47  ;;  %v353_v34 = vadd.f32 %v337_v31, %v190_v48  ;;  %v343_v52 = vmul.f32 %v2613_v1, %v263_v32  ;;  %v2616_v47 = vld [vmem:[#allocation70_spill] sm:$0xff]  ;;  %v1157_v31 = vld [vmem:[%s2430_s0 + $0x78] sm:$0xff] }
 0x1d4   :  { %v594_v23 = vadd.f32 %v578_v8, %v498_v12  ;;  %v580_v44 = vmul.f32 %v1156_v40, %v2614_v19  ;;  %v196_v9 = vmul.f32 %v2615_v21, %v84_v39  ;;  %v410_v29 = vsel %vm392_vm3, %v2616_v47, 0.0  ;;  %v2619_v32 = vld [vmem:[#allocation44_spill] sm:$0xff] }
 0x1d5   :  { %v2281_v13 = vadd.f32 %v868_v61, %v737_v38  ;;  %v2284_v45 = vadd.f32 %v877_v16, %v2034_v7  ;;  %v792_v53 = vsel %vm782_vm4, %v2041_v25, 0.0  ;;  %v500_v38 = vadd.f32 %v484_v24, %v353_v34  ;;  %v2617_v61 = vld [vmem:[#allocation81_spill] sm:$0xff]  ;;  %v2620_v1 = vld [vmem:[#allocation56_spill] sm:$0xff] }
 0x1d6   :  { %v823_v22 = vpop.permute.xlu1 %822  ;;  %v2293_v59 = vpop.permute.xlu0 %899  ;;  %v490_v16 = vmul.f32 %v2617_v61, %v410_v29  ;;  %v741_v14 = vadd.f32 %v1905_v20, %v594_v23  ;;  %v359_v10 = vadd.f32 %v343_v52, %v196_v9  ;;  %v586_v63 = vmul.f32 %v1157_v31, %v2618_v6  ;;  %v2621_v23 = vld [vmem:[#allocation20_spill] sm:$0xff] }
 0x1d7   :  { %v870_v7 = vmul.f32 %v823_v22, %v790_v46  ;;  %v596_v33 = vadd.f32 %v580_v44, %v500_v38  ;;  %v794_v25 = vsel %vm782_vm4, %v2048_v54, 0.0  ;;  %v800_v22 = vsel %vm782_vm4, %v2088_v42, 0.0  ;;  %v2622_v40 = vld [vmem:[#allocation68_spill] sm:$0xff] }
 0x1d8   :  { %v506_v48 = vadd.f32 %v490_v16, %v359_v10  ;;  %v261_v34 = vsel %vm245_vm1, %v2619_v32, 0.0  ;;  %v408_v19 = vsel %vm392_vm3, %v2622_v40, 0.0  ;;  %v2623_v44 = vld [vmem:[#allocation32_spill] sm:$0xff] }
 0x1d9   :  { %v2308_v17 = vadd.f32 %v870_v7, %v739_v3  ;;  %v743_v20 = vadd.f32 %v1914_v27, %v596_v33  ;;  %v341_v52 = vmul.f32 %v2620_v1, %v261_v34  ;;  %v2624_v9 = vld [vmem:[#allocation80_spill] sm:$0xff]  ;;  %v798_v33 = vsel %vm782_vm4, %v2066_v62, 0.0 }
 0x1da   :  { %v831_v11 = vpop.permute.xlu1 %830  ;;  %v916_v5 = vpop.permute.xlu0 %915  ;;  %v602_v4 = vadd.f32 %v586_v63, %v506_v48  ;;  %v488_v47 = vmul.f32 %v2624_v9, %v408_v19  ;;  %v2625_v38 = vld [vmem:[#allocation92_spill] sm:$0xff]  ;;  %v933_v63 = vsel %vm929_vm5, %v2293_v59, 0.0 }
 0x1db   :  { %v872_v49 = vmul.f32 %v831_v11, %v792_v53  ;;  %v1158_v11 = vld [vmem:[%s2430_s0 + $0x68] sm:$0xff] }
 0x1dc   :  { %v749_v37 = vadd.f32 %v1970_v58, %v602_v4  ;;  %v82_v58 = vsel %vm66_vm2, %v2621_v23, 0.0  ;;  %v584_v61 = vmul.f32 %v1158_v11, %v2625_v38  ;;  %v941_v4 = vsel %vm929_vm5, %v916_v5, 0.0 }
 0x1dd   :  { %v2323_v51 = vadd.f32 %v872_v49, %v741_v14  ;;  %v194_v21 = vmul.f32 %v2623_v44, %v82_v58 }
 0x1de   :  { %v839_v8 = vpop.permute.xlu1 %838  ;;  %v902_v36 = vpop.permute.xlu0 %901 }
 0x1df   :  { %v874_v2 = vmul.f32 %v839_v8, %v794_v25  ;;  %v357_v53 = vadd.f32 %v341_v52, %v194_v21  ;;  %v934_v8 = vsel %vm929_vm5, %v902_v36, 0.0 }
 0x1e1   :  { %v890_v46 = vadd.f32 %v874_v2, %v743_v20  ;;  %v504_v14 = vadd.f32 %v488_v47, %v357_v53 }
 0x1e2   :  { %v863_v12 = vpop.permute.xlu0 %862 }
 0x1e3   :  { %v880_v24 = vmul.f32 %v863_v12, %v800_v22  ;;  %v950_v3 = vpop.permute.xlu1 %949  ;;  %v600_v49 = vadd.f32 %v584_v61, %v504_v14 }
 0x1e5   :  { %v2333_v7 = vadd.f32 %v880_v24, %v749_v37  ;;  %v747_v6 = vadd.f32 %v1948_v50, %v600_v49 }
 0x1e7   :  { %v982_v54 = vpop.permute.xlu1 %981  ;;  %v954_v41 = vpop.permute.xlu0 %953 }
 0x1e8   :  { %v1013_v20 = vmul.f32 %v954_v41, %v933_v63 }
 0x1ea   :  { %v1029_v37 = vadd.f32 %v1013_v20, %v2127_v57  ;;  %v799_v57 = vsel %vm782_vm4, %v2198_v60, 0.0 }
 0x1eb   :  { %v986_v39 = vpop.permute.xlu1 %985  ;;  %v2335_v56 = vpop.permute.xlu0 %993 }
 0x1ec   :  { %v1021_v59 = vmul.f32 %v986_v39, %v941_v4 }
 0x1ee   :  { %v1037_v52 = vadd.f32 %v1021_v59, %v890_v46 }
 0x1ef   :  { %v958_v27 = vpop.permute.xlu1 %957  ;;  %v998_v29 = vpop.permute.xlu0 %997 }
 0x1f0   :  { %v1014_v50 = vmul.f32 %v958_v27, %v934_v8 }
 0x1f2   :  { %v1030_v41 = vadd.f32 %v1014_v50, %v2259_v55 }
 0x1f3   :  { %v990_v42 = vpop.permute.xlu1 %989  ;;  %v2354_v10 = vpop.permute.xlu0 %969 }
 0x1f7   :  { %v962_v16 = vpop.permute.xlu1 %961  ;;  %v2367_v22 = vpop.permute.xlu0 %973 }
 0x1fb   :  { %v922_v1 = vpop.permute.xlu0 %921 }
 0x1fc   :  { %v855_v31 = vpop.permute.xlu1 %854  ;;  %v944_v38 = vsel %vm929_vm5, %v922_v1, 0.0 }
 0x1fd   :  { %v878_v25 = vmul.f32 %v855_v31, %v798_v33 }
 0x1ff   :  { %v894_v48 = vadd.f32 %v878_v25, %v747_v6 }
 0x200   :  { %v898_v2 = vpop.permute.xlu1 %897 }
 0x201   :  { %v932_v62 = vsel %vm929_vm5, %v898_v2, 0.0 }
 0x202   :  { %v1012_v12 = vmul.f32 %v950_v3, %v932_v62 }
 0x204   :  { %v1028_v24 = vadd.f32 %v1012_v12, %v2233_v0  ;;  %v914_v32 = vpop.permute.xlu1 %913  ;;  %v1010_v0 = vpop.permute.xlu0 %1009 }
 0x205   :  { %v940_v36 = vsel %vm929_vm5, %v914_v32, 0.0 }
 0x206   :  { %v1044_v34 = vadd.f32 %v1029_v37, %v1028_v24  ;;  %v1020_v5 = vmul.f32 %v982_v54, %v940_v36 }
 0x208   :  { %v1036_v23 = vadd.f32 %v1020_v5, %v2214_v18  ;;  %v966_v58 = vpop.permute.xlu1 %965  ;;  %v1045_v27 = vadd.f32 %v1044_v34, %v1030_v41  ;;  %v924_v54 = vpop.permute.xlu0 %923 }
 0x209   :  { %v945_v14 = vsel %vm929_vm5, %v924_v54, 0.0 }
 0x20a   :  { %v1057_v3 = vadd.f32 %v1037_v52, %v1036_v23 }
 0x20c   :  { %v926_v47 = vpop.permute.xlu0 %925 }
 0x20d   :  { %v859_v39 = vpop.permute.xlu1 %858 }
 0x20e   :  { %v879_v40 = vmul.f32 %v859_v39, %v799_v57 }
 0x210   :  { %v895_v19 = vadd.f32 %v879_v40, %v2043_v30  ;;  %v928_v49 = vpop.permute.xlu0 %927 }
 0x211   :  { %v918_v44 = vpop.permute.xlu1 %917 }
 0x212   :  { %v942_v55 = vsel %vm929_vm5, %v918_v44, 0.0 }
 0x213   :  { %v1022_v46 = vmul.f32 %v990_v42, %v942_v55  ;;  %v1024_v42 = vmul.f32 %v998_v29, %v944_v38 }
 0x215   :  { %v1038_v18 = vadd.f32 %v1022_v46, %v2236_v26  ;;  %v1002_v21 = vpop.permute.xlu1 %1001  ;;  %v1040_v8 = vadd.f32 %v1024_v42, %v2284_v45  ;;  %v1071_v46 = vstv %s2432_s2  ;;  %s1098_s2 = sshll.u32 %s1196_s24, 4  ;;  %s1099_s2 = int_to_ptr.vmem [resolvable:$true] %s1098_s2 }
 0x216   :  { %v1025_v6 = vmul.f32 %v1002_v21, %v945_v14  ;;  %s1159_s1 = scalar_lea.vmem %s1099_s2, 32  ;;  %p1164_p1 = scmp.lt.s32.totalorder %s1099_s2, %s1099_s2 }
 0x217   :  { %v1058_v9 = vadd.f32 %v1057_v3, %v1038_v18  ;;  %p1160_p0 = scmp.ne.s32.totalorder %s1099_s2, %s1159_s1  ;;  %p1165_p2 = scmp.lt.s32.totalorder %s1159_s1, %s1159_s1 }
 0x218   :  { %v1041_v29 = vadd.f32 %v1025_v6, %v894_v48 }
 0x219   :  { %v904_v53 = vpop.permute.xlu1 %903  ;;  %p1166_p3 = por %p1165_p2, %p1164_p1 }
 0x21a   :  { %v935_v60 = vsel %vm929_vm5, %v904_v53, 0.0 }
 0x21b   :  { %v1015_v11 = vmul.f32 %v962_v16, %v935_v60  ;;  %v946_v16 = vsel %vm929_vm5, %v926_v47, 0.0  ;;  %p1167_p4 = pnand %p1166_p3, %p1160_p0 }
 0x21d   :  { %v1031_v30 = vadd.f32 %v1015_v11, %v2281_v13  ;;  %v920_v61 = vpop.permute.xlu1 %919  ;;  %v947_v13 = vsel %vm929_vm5, %v928_v49, 0.0 }
 0x21e   :  { %v943_v26 = vsel %vm929_vm5, %v920_v61, 0.0  ;;  %v1027_v4 = vmul.f32 %v1010_v0, %v947_v13 }
 0x21f   :  { %v1046_v33 = vadd.f32 %v1045_v27, %v1031_v30  ;;  %v1023_v31 = vmul.f32 %v2335_v56, %v943_v26 }
 0x221   :  { %v1039_v63 = vadd.f32 %v1023_v31, %v2261_v35  ;;  %v1006_v25 = vpop.permute.xlu1 %1005  ;;  %v1043_v35 = vadd.f32 %v1027_v4, %v2333_v7 }
 0x222   :  { %v1026_v2 = vmul.f32 %v1006_v25, %v946_v16 }
 0x223   :  { %v1059_v20 = vadd.f32 %v1058_v9, %v1039_v63 }
 0x224   :  { %v1042_v12 = vadd.f32 %v1026_v2, %v895_v19 }
 0x225   :  { %v1060_v62 = vadd.f32 %v1059_v20, %v1040_v8  ;;  %v906_v50 = vpop.permute.xlu1 %905 }
 0x226   :  { %v936_v56 = vsel %vm929_vm5, %v906_v50, 0.0 }
 0x227   :  { %v1061_v37 = vadd.f32 %v1060_v62, %v1041_v29  ;;  %v1016_v59 = vmul.f32 %v966_v58, %v936_v56 }
 0x229   :  { %v1062_v24 = vadd.f32 %v1061_v37, %v1042_v12  ;;  %v1032_v32 = vadd.f32 %v1016_v59, %v2154_v15  ;;  %v978_v36 = vpop.permute.xlu1 %977 }
 0x22b   :  { %v1063_v41 = vadd.f32 %v1062_v24, %v1043_v35  ;;  %v1047_v45 = vadd.f32 %v1046_v33, %v1032_v32 }
 0x22d   :  { %v1064_v34 = vrot.slane %v1063_v41, 4  ;;  %v908_v5 = vpop.permute.xlu1 %907 }
 0x22e   :  { %v937_v48 = vsel %vm929_vm5, %v908_v5, 0.0 }
 0x22f   :  { %v1065_v1 = vadd.f32 %v1064_v34, %v1063_v41  ;;  %v1017_v52 = vmul.f32 %v2354_v10, %v937_v48 }
 0x231   :  { %v1066_v23 = vrot.slane %v1065_v1, 2  ;;  %v1033_v27 = vadd.f32 %v1017_v52, %v2308_v17  ;;  %v910_v58 = vpop.permute.xlu1 %909 }
 0x232   :  { %v938_v7 = vsel %vm929_vm5, %v910_v58, 0.0 }
 0x233   :  { %v1048_v3 = vadd.f32 %v1047_v45, %v1033_v27  ;;  %v1018_v15 = vmul.f32 %v2367_v22, %v938_v7  ;;  %v1067_v57 = vadd.f32 %v1066_v23, %v1065_v1 }
 0x235   :  { %v1034_v0 = vadd.f32 %v1018_v15, %v2187_v43  ;;  %v912_v39 = vpop.permute.xlu1 %911  ;;  %v1068_v10 = vrot.slane %v1067_v57, 1 }
 0x236   :  { %v939_v40 = vsel %vm929_vm5, %v912_v39, 0.0 }
 0x237   :  { %v1049_v19 = vadd.f32 %v1048_v3, %v1034_v0  ;;  %v1019_v44 = vmul.f32 %v978_v36, %v939_v40  ;;  %v1069_v54 = vadd.f32 %v1068_v10, %v1067_v57 }
 0x239   :  { %v1035_v55 = vadd.f32 %v1019_v44, %v2323_v51  ;;  %v1073_v21 = vadd.f32 %v1071_v46, %v1069_v54 }
 0x23b   :  { %v1050_v17 = vadd.f32 %v1049_v19, %v1035_v55  ;;  %v1107_v47 = vmul.f32 -1.442695, %v1073_v21 }
 0x23d   :  { %v1051_v18 = vrot.slane %v1050_v17, 4  ;;  %1140 = vpow2.f32 %v1107_v47 }
 0x23f   :  { %v1052_v22 = vadd.f32 %v1051_v18, %v1050_v17 }
 0x241   :  { %v1053_v9 = vrot.slane %v1052_v22, 2 }
 0x243   :  { %v1054_v43 = vadd.f32 %v1053_v9, %v1052_v22 }
 0x245   :  { %v1055_v53 = vrot.slane %v1054_v43, 1 }
 0x247   :  { %v1056_v28 = vadd.f32 %v1055_v53, %v1054_v43  ;;  %v1141_v38 = vpop.eup %1140 }
 0x248   :  { %v1081_v51 = vadd.f32 1.0, %v1141_v38 }
 0x249   :  { %v1072_v60 = vadd.f32 %v1071_v46, %v1056_v28 }
 0x24b   :  { %v1106_v11 = vmul.f32 -1.442695, %v1072_v60 }
 0x24d   :  { %1142 = vpow2.f32 %v1106_v11 }
 0x24e   :  { %1144 = vrcp.f32 %v1081_v51 }
 0x257   :  { %v1143_v30 = vpop.eup %1142 }
 0x258   :  { %v1080_v61 = vadd.f32 1.0, %v1143_v30  ;;  %v1145_v14 = vpop.eup %1144 }
 0x25a   :  { %1146 = vrcp.f32 %v1080_v61 }
 0x264   :  { %v1147_v26 = vpop.eup %1146 }
 0x265   :  { %v1089_v42 = vsel %vm1088_vm6, %v1145_v14, %v1147_v26 }
 0x266   :  { %1091 = vst [vmem:[#allocation3] sm:$0x3] %v1089_v42 }
 0x267   :  { %1170 = shalt.err (!%p1167_p4)
}
 0x268   :  { %s1171_s26 = scalar_lea.hbm %s2433_s3, 32 }
 0x269   :  { %p1172_p5 = scmp.ne.s32.totalorder %s2433_s3, %s1171_s26  ;;  %p1175_p6 = scmp.lt.u32.totalorder %s1171_s26, %s2433_s3 }
 0x26b   :  { %p1177_p7 = pnand %p1175_p6, %p1172_p5 }
 0x26d   :  { %1180 = shalt.err (!%p1177_p7)
}
 0x26e   :  { %1101 = dma.vmem_to_hbm [thread:$0]  %s1099_s2, 32, %s2433_s3, [#allocation4]  }
 0x26f   :  { %1181 = dma.done.wait [#allocation4], 32  }
 0x270   :  { %1182 = vsyncadd [#allocation4], 4294967264 }
 0x271   :  { %1105 = vsyncpa [#allocation4], 1 }

</bundles_post_ra>
